<compile_context>
chip_gen: v7x
topology: tpu7x:2x2x1
jax: 0.10.0
libtpu: 0.0.40
codegen_flags: <defaults>
</compile_context>

<pallas_src>
import math
import functools

import jax
import jax.numpy as jnp
from jax import lax
from jax.experimental import pallas as pl
from jax.experimental.pallas import tpu as pltpu

# ----------------------- model hyper-parameters -----------------------------
TX_DIM       = 32
TX_DEPTH     = 2
HEADS        = 4
DIM_HEAD     = TX_DIM // HEADS          # 8
LATENT_DIM   = 16
MAX_SEQ_LEN  = 64
TIME_EMB_DIM = TX_DIM * 4               # 128
FF_INNER     = TX_DIM * 4               # 128 (ff_mult=4, GEGLU feed-forward)
LN_EPS       = 1e-5
ATTN_SCALE   = DIM_HEAD ** -0.5
NEG_INF      = -1e9

# ---------------- packed gain/bias slab layout (width = 256 lanes) ----------
VEC_W = 2 * FF_INNER                    # 256 (widest bias: GEGLU ff_b1)
(VR_IN_B, VR_TPOS_B, VR_TIME_B1, VR_TIME_B2,
 VR_ENC_G, VR_ENC_B, VR_NORM_G, VR_NORM_B, VR_OUT_B) = range(9)
VR_LAYER0 = 9
(VL_ATTN_G, VL_ATTN_B, VL_BO, VL_FF_G, VL_FF_B, VL_FF_B2, VL_FF_B1) = range(7)
VL_NROWS = 7
VEC_ROWS = VR_LAYER0 + TX_DEPTH * VL_NROWS

# ---------------- packed global-matrix slab layout (width = 128 lanes) ------
GM_W       = TIME_EMB_DIM               # 128
GR_IN_W    = 0                          # (LATENT_DIM, TX_DIM)
GR_TIME_W1 = GR_IN_W + LATENT_DIM       # (TX_DIM, TIME_EMB_DIM)
GR_TIME_W2 = GR_TIME_W1 + TX_DIM        # (TIME_EMB_DIM, TIME_EMB_DIM)
GR_TPOS_W  = GR_TIME_W2 + TIME_EMB_DIM  # (TIME_EMB_DIM, TX_DIM)
GR_OUT_W   = GR_TPOS_W + TIME_EMB_DIM   # (TX_DIM, LATENT_DIM)
GM_ROWS    = GR_OUT_W + TX_DIM          # 336 rows (all offsets multiples of 8)


def _gelu(x):
    # TODO(synk): torch nn.GELU defaults to the exact erf form; the tanh
    # approximation is used for Mosaic-safe lowering (EUP tanh), ~1e-3 drift.
    return jax.nn.gelu(x, approximate=True)


def _layernorm(x, g, b):
    mu = jnp.mean(x, axis=-1, keepdims=True)
    xc = x - mu
    var = jnp.mean(xc * xc, axis=-1, keepdims=True)
    return xc * lax.rsqrt(var + LN_EPS) * g + b


def _mm(a, w):
    return jnp.dot(a, w, preferred_element_type=jnp.float32)


# ------------------------------ fused kernel ---------------------------------
def _fused_forward_kernel(keep_ref, sinu_ref, x_ref, pos_ref,
                          vec_ref, gm_ref, attnw_ref, ffw1_ref, ffw2_ref,
                          o_ref, *, batch):
    BS, L = x_ref.shape                       # BS = B*S (batch folded into rows)
    B = batch
    S = BS // B
    D = TX_DIM

    def vrow(r, w):                           # one packed gain/bias row
        return vec_ref[r:r + 1, :w]           # (1, w)

    # ---- time_mlp: Linear -> GELU -> Linear, then GELU -> Linear (tpos) ----
    # sinu rows are already repeated per (batch, position), so the whole time
    # MLP runs at M=BS and its output is directly the per-row additive term.
    sinu = sinu_ref[...]                                            # (BS, D)
    h1 = _gelu(_mm(sinu, gm_ref[GR_TIME_W1:GR_TIME_W1 + D, :TIME_EMB_DIM])
               + vrow(VR_TIME_B1, TIME_EMB_DIM))                    # (BS, 4D)
    time_emb = (_mm(h1, gm_ref[GR_TIME_W2:GR_TIME_W2 + TIME_EMB_DIM,
                               :TIME_EMB_DIM])
                + vrow(VR_TIME_B2, TIME_EMB_DIM))                   # (BS, 4D)
    tpe = (_mm(_gelu(time_emb),
               gm_ref[GR_TPOS_W:GR_TPOS_W + TIME_EMB_DIM, :D])
           + vrow(VR_TPOS_B, D))                                    # (BS, D)

    # ---- input projection + (pre-scaled) positional embedding -------------
    pos_s = pos_ref[:S, :]                                          # (S, D)
    pos_full = jnp.concatenate([pos_s] * B, axis=0)                 # (BS, D)
    h = (_mm(x_ref[...], gm_ref[GR_IN_W:GR_IN_W + L, :D])
         + vrow(VR_IN_B, D) + pos_full + tpe)                       # (BS, D)

    # key-keep mask, block-diagonal over batches (built in the wrapper)
    keep = keep_ref[...] > 0.0                                      # (BS, BS)

    # TODO(synk): x-transformers `Encoder` source not provided; implemented
    # with its defaults: pre-norm MHSA + GEGLU FF, key-masked softmax, no
    # rel-pos bias, final LayerNorm, dropout inactive, scale_shift=False.
    for l in range(TX_DEPTH):
        base = VR_LAYER0 + l * VL_NROWS

        # -------- pre-norm self-attention (combined per-head weights) -------
        hn = _layernorm(h, vrow(base + VL_ATTN_G, D), vrow(base + VL_ATTN_B, D))
        acc = None
        for hh in range(HEADS):
            blk = (l * HEADS + hh) * 2
            a_h = attnw_ref[blk]        # (D, D) = (scale*Wq_h) @ Wk_h^T
            bv_h = attnw_ref[blk + 1]   # (D, D) = Wv_h @ Wo_h
            p = _mm(hn, a_h)                                        # (BS, D)
            s = lax.dot_general(p, hn, (((1,), (1,)), ((), ())),
                                preferred_element_type=jnp.float32)  # (BS, BS)
            s = jnp.where(keep, s, NEG_INF)
            s = s - jnp.max(s, axis=-1, keepdims=True)
            e = jnp.exp(s)
            attn = e / jnp.sum(e, axis=-1, keepdims=True)
            term = _mm(attn, _mm(hn, bv_h))                         # (BS, D)
            acc = term if acc is None else acc + term
        h = h + acc + vrow(base + VL_BO, D)

        # -------- pre-norm GEGLU feed-forward (fully fused) ------------------
        hn = _layernorm(h, vrow(base + VL_FF_G, D), vrow(base + VL_FF_B, D))
        g = _mm(hn, ffw1_ref[l]) + vrow(base + VL_FF_B1, 2 * FF_INNER)
        gg = g[:, :FF_INNER] * _gelu(g[:, FF_INNER:])               # (BS, inner)
        h = h + _mm(gg, ffw2_ref[l]) + vrow(base + VL_FF_B2, D)

    # ---- epilogue: encoder final norm -> self.norm -> output projection ----
    h = _layernorm(h, vrow(VR_ENC_G, D), vrow(VR_ENC_B, D))
    h = _layernorm(h, vrow(VR_NORM_G, D), vrow(VR_NORM_B, D))
    o_ref[...] = (_mm(h, gm_ref[GR_OUT_W:GR_OUT_W + D, :LATENT_DIM])
                  + vrow(VR_OUT_B, LATENT_DIM))


# ------------------------------ parameters ----------------------------------
def init_params(key):
    """Semantic (module-like) parameters."""
    def nrm(k, shape, std=0.02):
        return std * jax.random.normal(k, shape, jnp.float32)

    keys = iter(jax.random.split(key, 16))
    D = TX_DIM
    return {
        "pos_emb": nrm(next(keys), (MAX_SEQ_LEN, D)),
        "time_w1": nrm(next(keys), (D, TIME_EMB_DIM)),
        "time_b1": jnp.zeros((1, TIME_EMB_DIM), jnp.float32),
        "time_w2": nrm(next(keys), (TIME_EMB_DIM, TIME_EMB_DIM)),
        "time_b2": jnp.zeros((1, TIME_EMB_DIM), jnp.float32),
        "tpos_w": nrm(next(keys), (TIME_EMB_DIM, D)),
        "tpos_b": jnp.zeros((1, D), jnp.float32),
        "in_w": nrm(next(keys), (LATENT_DIM, D)),
        "in_b": jnp.zeros((1, D), jnp.float32),
        "attn_g": jnp.ones((TX_DEPTH, D), jnp.float32),
        "attn_b": jnp.zeros((TX_DEPTH, D), jnp.float32),
        "wqkv": nrm(next(keys), (TX_DEPTH, D, 3 * D)),   # fused q/k/v (no bias)
        "wo": nrm(next(keys), (TX_DEPTH, D, D)),
        "bo": jnp.zeros((TX_DEPTH, D), jnp.float32),
        "ff_g": jnp.ones((TX_DEPTH, D), jnp.float32),
        "ff_b": jnp.zeros((TX_DEPTH, D), jnp.float32),
        "ff_w1": nrm(next(keys), (TX_DEPTH, D, 2 * FF_INNER)),
        "ff_b1": jnp.zeros((TX_DEPTH, 2 * FF_INNER), jnp.float32),
        "ff_w2": nrm(next(keys), (TX_DEPTH, FF_INNER, D)),
        "ff_b2": jnp.zeros((TX_DEPTH, D), jnp.float32),
        "enc_g": jnp.ones((1, D), jnp.float32),
        "enc_b": jnp.zeros((1, D), jnp.float32),
        "norm_g": jnp.ones((1, D), jnp.float32),
        "norm_b": jnp.zeros((1, D), jnp.float32),
        # output_proj is zero-initialized in the module (init_zero_)
        "out_w": jnp.zeros((D, LATENT_DIM), jnp.float32),
        "out_b": jnp.zeros((1, LATENT_DIM), jnp.float32),
    }


def pack_params(p):
    """One-time packing of the 26 module tensors into 6 lane-dense slabs
    (runs outside the per-call path).  Also folds ATTN_SCALE into the q/k
    product and dim**-0.5 into the positional embedding."""
    D = TX_DIM
    f32 = jnp.float32

    def vec_row(v):
        v = jnp.asarray(v, f32).reshape(-1)
        return jnp.pad(v, (0, VEC_W - v.shape[0])).reshape(1, VEC_W)

    rows = [None] * VEC_ROWS
    rows[VR_IN_B] = vec_row(p["in_b"]);       rows[VR_TPOS_B] = vec_row(p["tpos_b"])
    rows[VR_TIME_B1] = vec_row(p["time_b1"]); rows[VR_TIME_B2] = vec_row(p["time_b2"])
    rows[VR_ENC_G] = vec_row(p["enc_g"]);     rows[VR_ENC_B] = vec_row(p["enc_b"])
    rows[VR_NORM_G] = vec_row(p["norm_g"]);   rows[VR_NORM_B] = vec_row(p["norm_b"])
    rows[VR_OUT_B] = vec_row(p["out_b"])
    for l in range(TX_DEPTH):
        base = VR_LAYER0 + l * VL_NROWS
        rows[base + VL_ATTN_G] = vec_row(p["attn_g"][l])
        rows[base + VL_ATTN_B] = vec_row(p["attn_b"][l])
        rows[base + VL_BO]     = vec_row(p["bo"][l])
        rows[base + VL_FF_G]   = vec_row(p["ff_g"][l])
        rows[base + VL_FF_B]   = vec_row(p["ff_b"][l])
        rows[base + VL_FF_B2]  = vec_row(p["ff_b2"][l])
        rows[base + VL_FF_B1]  = vec_row(p["ff_b1"][l])
    vecs = jnp.concatenate(rows, axis=0)                       # (VEC_ROWS, 256)

    def gm_block(m):
        m = jnp.asarray(m, f32)
        return jnp.pad(m, ((0, 0), (0, GM_W - m.shape[1])))

    gmats = jnp.concatenate(
        [gm_block(p["in_w"]), gm_block(p["time_w1"]), gm_block(p["time_w2"]),
         gm_block(p["tpos_w"]), gm_block(p["out_w"])], axis=0)  # (GM_ROWS, 128)

    # Combined per-(layer, head) attention weights (exact block decomposition):
    #   A_h  = (scale * Wq_h) @ Wk_h^T   ->  scores = hn @ A_h @ hn^T
    #   Bv_h = Wv_h @ Wo_h               ->  out   += attn_h @ (hn @ Bv_h)
    blocks = []
    for l in range(TX_DEPTH):
        wqkv = jnp.asarray(p["wqkv"][l], f32)      # (D, 3D)
        wo = jnp.asarray(p["wo"][l], f32)          # (D, D)
        for hh in range(HEADS):
            c0 = hh * DIM_HEAD
            wq = wqkv[:, c0:c0 + DIM_HEAD] * ATTN_SCALE
            wk = wqkv[:, D + c0:D + c0 + DIM_HEAD]
            wv = wqkv[:, 2 * D + c0:2 * D + c0 + DIM_HEAD]
            wo_h = wo[c0:c0 + DIM_HEAD, :]
            blocks.append(wq @ wk.T)               # (D, D)
            blocks.append(wv @ wo_h)               # (D, D)
    attnw = jnp.stack(blocks, axis=0)              # (DEPTH*HEADS*2, D, D)

    return {
        "pos": jnp.asarray(p["pos_emb"], f32) * (D ** -0.5),   # pre-scaled
        "vecs": vecs, "gmats": gmats, "attnw": attnw,
        "ffw1": jnp.asarray(p["ff_w1"], f32),
        "ffw2": jnp.asarray(p["ff_w2"], f32),
    }


# ------------------------------ forward pass ---------------------------------
def diffusion_transformer_forward(packed, x, mask, time):
    """
    x:    (B, S, latent_dim) float32
    mask: (B, S) bool, False = masked key position
    time: (B,) float32
    """
    B, S, L = x.shape
    assert S <= MAX_SEQ_LEN and L == LATENT_DIM
    BS = B * S

    # SinusoidalPosEmb(time * 1000), one row per (batch, position).
    t = time.astype(jnp.float32) * 1000.0
    half = TX_DIM // 2
    freqs = jnp.exp(jnp.arange(half, dtype=jnp.float32)
                    * (-math.log(10000.0) / (half - 1)))
    ang = t[:, None] * freqs[None, :]
    sinu = jnp.concatenate([jnp.sin(ang), jnp.cos(ang)], axis=-1)   # (B, D)
    sinu_full = jnp.repeat(sinu, S, axis=0)                         # (BS, D)

    # Batch folded into rows: block-diagonal key-keep mask (B*S x B*S).
    same_batch = jnp.kron(jnp.eye(B, dtype=jnp.float32),
                          jnp.ones((S, S), jnp.float32))            # constant
    keep = same_batch * mask.reshape(1, BS).astype(jnp.float32)     # (BS, BS)

    x_flat = x.reshape(BS, L).astype(jnp.float32)

    vmem = lambda: pl.BlockSpec(memory_space=pltpu.MemorySpace.VMEM)
    # Single program (no grid): one TensorCore does the whole batch.  On v7x a
    # grid=(B,) "parallel" split is a measurement call; the fixed per-program
    # overhead usually loses at ~1-2us of total work.
    out = pl.pallas_call(
        functools.partial(_fused_forward_kernel, batch=B),
        out_shape=jax.ShapeDtypeStruct((BS, LATENT_DIM), jnp.float32),
        in_specs=[vmem() for _ in range(9)],
        out_specs=vmem(),
    )(keep, sinu_full, x_flat, packed["pos"], packed["vecs"],
      packed["gmats"], packed["attnw"], packed["ffw1"], packed["ffw2"])
    return out.reshape(B, S, LATENT_DIM)


# ----------------------------------- main ------------------------------------
if __name__ == "__main__":
    key = jax.random.PRNGKey(0)
    kp, kx, kt, kw, kb = jax.random.split(key, 5)
    params = init_params(kp)
    # The module zero-inits output_proj; override with small random weights so
    # the smoke test exercises (and checks finiteness of) the full datapath.
    params["out_w"] = 0.02 * jax.random.normal(kw, (TX_DIM, LATENT_DIM), jnp.float32)
    params["out_b"] = 0.02 * jax.random.normal(kb, (1, LATENT_DIM), jnp.float32)
    packed = pack_params(params)          # one-time, outside the forward path

    B, S = 2, 8
    x = jax.random.normal(kx, (B, S, LATENT_DIM), jnp.float32)
    mask = jnp.concatenate(
        [jnp.ones((B, 6), dtype=bool), jnp.zeros((B, S - 6), dtype=bool)], axis=1)
    time = jax.random.uniform(kt, (B,), jnp.float32)

    out = jax.jit(diffusion_transformer_forward)(packed, x, mask, time)
    out = jax.block_until_ready(out)
    assert out.shape == (B, S, LATENT_DIM)
    assert out.dtype == jnp.float32
    assert bool(jnp.all(jnp.isfinite(out)))
    print("KERNEL_OK")
</pallas_src>

<mosaic_0001>
module attributes {stable_mosaic.version = 11 : i64} {
  func.func @_fused_forward_kernel(%arg0: memref<16x16xf32, #tpu.memory_space<vmem>>, %arg1: memref<16x32xf32, #tpu.memory_space<vmem>>, %arg2: memref<16x16xf32, #tpu.memory_space<vmem>>, %arg3: memref<64x32xf32, #tpu.memory_space<vmem>>, %arg4: memref<23x256xf32, #tpu.memory_space<vmem>>, %arg5: memref<336x128xf32, #tpu.memory_space<vmem>>, %arg6: memref<16x32x32xf32, #tpu.memory_space<vmem>>, %arg7: memref<2x32x256xf32, #tpu.memory_space<vmem>>, %arg8: memref<2x128x32xf32, #tpu.memory_space<vmem>>, %arg9: memref<16x16xf32, #tpu.memory_space<vmem>>) attributes {dimension_semantics = [], scalar_prefetch = 0 : i64, scratch_operands = 0 : i64, tpu.core_type = #tpu.core_type<tc>} {
    %c0 = arith.constant 0 : index
    %c0_0 = arith.constant 0 : index
    %0 = vector.load %arg1[%c0, %c0_0] : memref<16x32xf32, #tpu.memory_space<vmem>>, vector<16x32xf32>
    %c16 = arith.constant 16 : index
    %c0_1 = arith.constant 0 : index
    %1 = vector.load %arg5[%c16, %c0_1] : memref<336x128xf32, #tpu.memory_space<vmem>>, vector<32x128xf32>
    %cst = arith.constant dense<0.000000e+00> : vector<16x128xf32>
    %2 = tpu.matmul %0, %1, %cst {dimension_numbers = #tpu.dot_dimension_numbers<[1], [0], [0], [1], [0, 0, 1, 1], [], []>} : vector<16x32xf32>, vector<32x128xf32>, vector<16x128xf32> -> vector<16x128xf32>
    %c2 = arith.constant 2 : index
    %c0_2 = arith.constant 0 : index
    %3 = vector.load %arg4[%c2, %c0_2] : memref<23x256xf32, #tpu.memory_space<vmem>>, vector<1x128xf32>
    %4 = vector.broadcast %3 : vector<1x128xf32> to vector<16x128xf32>
    %5 = arith.addf %2, %4 : vector<16x128xf32>
    %6 = arith.mulf %5, %5 : vector<16x128xf32>
    %7 = arith.mulf %5, %6 : vector<16x128xf32>
    %cst_3 = arith.constant 4.471500e-02 : f32
    %8 = vector.broadcast %cst_3 : f32 to vector<16x128xf32>
    %9 = arith.mulf %8, %7 : vector<16x128xf32>
    %10 = arith.addf %5, %9 : vector<16x128xf32>
    %cst_4 = arith.constant 0.797884583 : f32
    %11 = vector.broadcast %cst_4 : f32 to vector<16x128xf32>
    %12 = arith.mulf %11, %10 : vector<16x128xf32>
    %13 = math.tanh %12 : vector<16x128xf32>
    %cst_5 = arith.constant 1.000000e+00 : f32
    %14 = vector.broadcast %cst_5 : f32 to vector<16x128xf32>
    %15 = arith.addf %14, %13 : vector<16x128xf32>
    %cst_6 = arith.constant 5.000000e-01 : f32
    %16 = vector.broadcast %cst_6 : f32 to vector<16x128xf32>
    %17 = arith.mulf %16, %15 : vector<16x128xf32>
    %18 = arith.mulf %5, %17 : vector<16x128xf32>
    %c48 = arith.constant 48 : index
    %c0_7 = arith.constant 0 : index
    %19 = vector.load %arg5[%c48, %c0_7] : memref<336x128xf32, #tpu.memory_space<vmem>>, vector<128x128xf32>
    %cst_8 = arith.constant dense<0.000000e+00> : vector<16x128xf32>
    %20 = tpu.matmul %18, %19, %cst_8 {dimension_numbers = #tpu.dot_dimension_numbers<[1], [0], [0], [1], [0, 0, 1, 1], [], []>} : vector<16x128xf32>, vector<128x128xf32>, vector<16x128xf32> -> vector<16x128xf32>
    %c3 = arith.constant 3 : index
    %c0_9 = arith.constant 0 : index
    %21 = vector.load %arg4[%c3, %c0_9] : memref<23x256xf32, #tpu.memory_space<vmem>>, vector<1x128xf32>
    %22 = vector.broadcast %21 : vector<1x128xf32> to vector<16x128xf32>
    %23 = arith.addf %20, %22 : vector<16x128xf32>
    %24 = arith.mulf %23, %23 : vector<16x128xf32>
    %25 = arith.mulf %23, %24 : vector<16x128xf32>
    %cst_10 = arith.constant 4.471500e-02 : f32
    %26 = vector.broadcast %cst_10 : f32 to vector<16x128xf32>
    %27 = arith.mulf %26, %25 : vector<16x128xf32>
    %28 = arith.addf %23, %27 : vector<16x128xf32>
    %cst_11 = arith.constant 0.797884583 : f32
    %29 = vector.broadcast %cst_11 : f32 to vector<16x128xf32>
    %30 = arith.mulf %29, %28 : vector<16x128xf32>
    %31 = math.tanh %30 : vector<16x128xf32>
    %cst_12 = arith.constant 1.000000e+00 : f32
    %32 = vector.broadcast %cst_12 : f32 to vector<16x128xf32>
    %33 = arith.addf %32, %31 : vector<16x128xf32>
    %cst_13 = arith.constant 5.000000e-01 : f32
    %34 = vector.broadcast %cst_13 : f32 to vector<16x128xf32>
    %35 = arith.mulf %34, %33 : vector<16x128xf32>
    %36 = arith.mulf %23, %35 : vector<16x128xf32>
    %c176 = arith.constant 176 : index
    %c0_14 = arith.constant 0 : index
    %37 = vector.load %arg5[%c176, %c0_14] : memref<336x128xf32, #tpu.memory_space<vmem>>, vector<128x32xf32>
    %cst_15 = arith.constant dense<0.000000e+00> : vector<16x32xf32>
    %38 = tpu.matmul %36, %37, %cst_15 {dimension_numbers = #tpu.dot_dimension_numbers<[1], [0], [0], [1], [0, 0, 1, 1], [], []>} : vector<16x128xf32>, vector<128x32xf32>, vector<16x32xf32> -> vector<16x32xf32>
    %c1 = arith.constant 1 : index
    %c0_16 = arith.constant 0 : index
    %39 = vector.load %arg4[%c1, %c0_16] : memref<23x256xf32, #tpu.memory_space<vmem>>, vector<1x32xf32>
    %40 = vector.broadcast %39 : vector<1x32xf32> to vector<16x32xf32>
    %41 = arith.addf %38, %40 : vector<16x32xf32>
    %c0_17 = arith.constant 0 : index
    %c0_18 = arith.constant 0 : index
    %42 = vector.load %arg3[%c0_17, %c0_18] : memref<64x32xf32, #tpu.memory_space<vmem>>, vector<8x32xf32>
    %43 = tpu.concatenate %42, %42 in 0 : vector<8x32xf32>, vector<8x32xf32> -> vector<16x32xf32>
    %c0_19 = arith.constant 0 : index
    %c0_20 = arith.constant 0 : index
    %44 = vector.load %arg2[%c0_19, %c0_20] : memref<16x16xf32, #tpu.memory_space<vmem>>, vector<16x16xf32>
    %c0_21 = arith.constant 0 : index
    %c0_22 = arith.constant 0 : index
    %45 = vector.load %arg5[%c0_21, %c0_22] : memref<336x128xf32, #tpu.memory_space<vmem>>, vector<16x32xf32>
    %cst_23 = arith.constant dense<0.000000e+00> : vector<16x32xf32>
    %46 = tpu.matmul %44, %45, %cst_23 {dimension_numbers = #tpu.dot_dimension_numbers<[1], [0], [0], [1], [0, 0, 1, 1], [], []>} : vector<16x16xf32>, vector<16x32xf32>, vector<16x32xf32> -> vector<16x32xf32>
    %c0_24 = arith.constant 0 : index
    %c0_25 = arith.constant 0 : index
    %47 = vector.load %arg4[%c0_24, %c0_25] : memref<23x256xf32, #tpu.memory_space<vmem>>, vector<1x32xf32>
    %48 = vector.broadcast %47 : vector<1x32xf32> to vector<16x32xf32>
    %49 = arith.addf %46, %48 : vector<16x32xf32>
    %50 = arith.addf %49, %43 : vector<16x32xf32>
    %51 = arith.addf %50, %41 : vector<16x32xf32>
    %c0_26 = arith.constant 0 : index
    %c0_27 = arith.constant 0 : index
    %52 = vector.load %arg0[%c0_26, %c0_27] : memref<16x16xf32, #tpu.memory_space<vmem>>, vector<16x16xf32>
    %cst_28 = arith.constant 0.000000e+00 : f32
    %53 = vector.broadcast %cst_28 : f32 to vector<16x16xf32>
    %54 = arith.cmpf ogt, %52, %53 : vector<16x16xf32>
    %c9 = arith.constant 9 : index
    %c0_29 = arith.constant 0 : index
    %55 = vector.load %arg4[%c9, %c0_29] : memref<23x256xf32, #tpu.memory_space<vmem>>, vector<1x32xf32>
    %c10 = arith.constant 10 : index
    %c0_30 = arith.constant 0 : index
    %56 = vector.load %arg4[%c10, %c0_30] : memref<23x256xf32, #tpu.memory_space<vmem>>, vector<1x32xf32>
    %cst_31 = arith.constant dense<0.000000e+00> : vector<16xf32>
    %57 = vector.multi_reduction <add>, %51, %cst_31 [1] : vector<16x32xf32> to vector<16xf32>
    %58 = vector.shape_cast %57 : vector<16xf32> to vector<16x1xf32>
    %cst_32 = arith.constant 3.200000e+01 : f32
    %59 = vector.broadcast %cst_32 : f32 to vector<16x1xf32>
    %60 = arith.divf %58, %59 : vector<16x1xf32>
    %61 = vector.broadcast %60 : vector<16x1xf32> to vector<16x32xf32>
    %62 = arith.subf %51, %61 : vector<16x32xf32>
    %63 = arith.mulf %62, %62 : vector<16x32xf32>
    %cst_33 = arith.constant dense<0.000000e+00> : vector<16xf32>
    %64 = vector.multi_reduction <add>, %63, %cst_33 [1] : vector<16x32xf32> to vector<16xf32>
    %65 = vector.shape_cast %64 : vector<16xf32> to vector<16x1xf32>
    %cst_34 = arith.constant 3.200000e+01 : f32
    %66 = vector.broadcast %cst_34 : f32 to vector<16x1xf32>
    %67 = arith.divf %65, %66 : vector<16x1xf32>
    %cst_35 = arith.constant 9.99999974E-6 : f32
    %68 = vector.broadcast %cst_35 : f32 to vector<16x1xf32>
    %69 = arith.addf %67, %68 : vector<16x1xf32>
    %70 = math.rsqrt %69 : vector<16x1xf32>
    %71 = vector.broadcast %70 : vector<16x1xf32> to vector<16x32xf32>
    %72 = arith.mulf %62, %71 : vector<16x32xf32>
    %73 = vector.broadcast %55 : vector<1x32xf32> to vector<16x32xf32>
    %74 = arith.mulf %72, %73 : vector<16x32xf32>
    %75 = vector.broadcast %56 : vector<1x32xf32> to vector<16x32xf32>
    %76 = arith.addf %74, %75 : vector<16x32xf32>
    %c0_36 = arith.constant 0 : index
    %c0_37 = arith.constant 0 : index
    %c0_38 = arith.constant 0 : index
    %77 = vector.load %arg6[%c0_36, %c0_37, %c0_38] : memref<16x32x32xf32, #tpu.memory_space<vmem>>, vector<1x32x32xf32>
    %78 = vector.shape_cast %77 : vector<1x32x32xf32> to vector<32x32xf32>
    %c1_39 = arith.constant 1 : index
    %c0_40 = arith.constant 0 : index
    %c0_41 = arith.constant 0 : index
    %79 = vector.load %arg6[%c1_39, %c0_40, %c0_41] : memref<16x32x32xf32, #tpu.memory_space<vmem>>, vector<1x32x32xf32>
    %80 = vector.shape_cast %79 : vector<1x32x32xf32> to vector<32x32xf32>
    %cst_42 = arith.constant dense<0.000000e+00> : vector<16x32xf32>
    %81 = tpu.matmul %76, %78, %cst_42 {dimension_numbers = #tpu.dot_dimension_numbers<[1], [0], [0], [1], [0, 0, 1, 1], [], []>} : vector<16x32xf32>, vector<32x32xf32>, vector<16x32xf32> -> vector<16x32xf32>
    %cst_43 = arith.constant dense<0.000000e+00> : vector<16x16xf32>
    %82 = tpu.matmul %81, %76, %cst_43 {dimension_numbers = #tpu.dot_dimension_numbers<[1], [1], [0], [0], [0, 0, 1, 0], [], []>} : vector<16x32xf32>, vector<16x32xf32>, vector<16x16xf32> -> vector<16x16xf32>
    %cst_44 = arith.constant -1.000000e+09 : f32
    %83 = vector.broadcast %cst_44 : f32 to vector<16x16xf32>
    %84 = arith.select %54, %82, %83 : vector<16x16xi1>, vector<16x16xf32>
    %cst_45 = arith.constant dense<0xFF800000> : vector<16xf32>
    %85 = vector.multi_reduction <maximumf>, %84, %cst_45 [1] : vector<16x16xf32> to vector<16xf32>
    %86 = vector.shape_cast %85 : vector<16xf32> to vector<16x1xf32>
    %87 = vector.broadcast %86 : vector<16x1xf32> to vector<16x16xf32>
    %88 = arith.subf %84, %87 : vector<16x16xf32>
    %89 = math.exp %88 : vector<16x16xf32>
    %cst_46 = arith.constant dense<0.000000e+00> : vector<16xf32>
    %90 = vector.multi_reduction <add>, %89, %cst_46 [1] : vector<16x16xf32> to vector<16xf32>
    %91 = vector.shape_cast %90 : vector<16xf32> to vector<16x1xf32>
    %92 = vector.broadcast %91 : vector<16x1xf32> to vector<16x16xf32>
    %93 = arith.divf %89, %92 : vector<16x16xf32>
    %cst_47 = arith.constant dense<0.000000e+00> : vector<16x32xf32>
    %94 = tpu.matmul %76, %80, %cst_47 {dimension_numbers = #tpu.dot_dimension_numbers<[1], [0], [0], [1], [0, 0, 1, 1], [], []>} : vector<16x32xf32>, vector<32x32xf32>, vector<16x32xf32> -> vector<16x32xf32>
    %cst_48 = arith.constant dense<0.000000e+00> : vector<16x32xf32>
    %95 = tpu.matmul %93, %94, %cst_48 {dimension_numbers = #tpu.dot_dimension_numbers<[1], [0], [0], [1], [0, 0, 1, 1], [], []>} : vector<16x16xf32>, vector<16x32xf32>, vector<16x32xf32> -> vector<16x32xf32>
    %c2_49 = arith.constant 2 : index
    %c0_50 = arith.constant 0 : index
    %c0_51 = arith.constant 0 : index
    %96 = vector.load %arg6[%c2_49, %c0_50, %c0_51] : memref<16x32x32xf32, #tpu.memory_space<vmem>>, vector<1x32x32xf32>
    %97 = vector.shape_cast %96 : vector<1x32x32xf32> to vector<32x32xf32>
    %c3_52 = arith.constant 3 : index
    %c0_53 = arith.constant 0 : index
    %c0_54 = arith.constant 0 : index
    %98 = vector.load %arg6[%c3_52, %c0_53, %c0_54] : memref<16x32x32xf32, #tpu.memory_space<vmem>>, vector<1x32x32xf32>
    %99 = vector.shape_cast %98 : vector<1x32x32xf32> to vector<32x32xf32>
    %cst_55 = arith.constant dense<0.000000e+00> : vector<16x32xf32>
    %100 = tpu.matmul %76, %97, %cst_55 {dimension_numbers = #tpu.dot_dimension_numbers<[1], [0], [0], [1], [0, 0, 1, 1], [], []>} : vector<16x32xf32>, vector<32x32xf32>, vector<16x32xf32> -> vector<16x32xf32>
    %cst_56 = arith.constant dense<0.000000e+00> : vector<16x16xf32>
    %101 = tpu.matmul %100, %76, %cst_56 {dimension_numbers = #tpu.dot_dimension_numbers<[1], [1], [0], [0], [0, 0, 1, 0], [], []>} : vector<16x32xf32>, vector<16x32xf32>, vector<16x16xf32> -> vector<16x16xf32>
    %cst_57 = arith.constant -1.000000e+09 : f32
    %102 = vector.broadcast %cst_57 : f32 to vector<16x16xf32>
    %103 = arith.select %54, %101, %102 : vector<16x16xi1>, vector<16x16xf32>
    %cst_58 = arith.constant dense<0xFF800000> : vector<16xf32>
    %104 = vector.multi_reduction <maximumf>, %103, %cst_58 [1] : vector<16x16xf32> to vector<16xf32>
    %105 = vector.shape_cast %104 : vector<16xf32> to vector<16x1xf32>
    %106 = vector.broadcast %105 : vector<16x1xf32> to vector<16x16xf32>
    %107 = arith.subf %103, %106 : vector<16x16xf32>
    %108 = math.exp %107 : vector<16x16xf32>
    %cst_59 = arith.constant dense<0.000000e+00> : vector<16xf32>
    %109 = vector.multi_reduction <add>, %108, %cst_59 [1] : vector<16x16xf32> to vector<16xf32>
    %110 = vector.shape_cast %109 : vector<16xf32> to vector<16x1xf32>
    %111 = vector.broadcast %110 : vector<16x1xf32> to vector<16x16xf32>
    %112 = arith.divf %108, %111 : vector<16x16xf32>
    %cst_60 = arith.constant dense<0.000000e+00> : vector<16x32xf32>
    %113 = tpu.matmul %76, %99, %cst_60 {dimension_numbers = #tpu.dot_dimension_numbers<[1], [0], [0], [1], [0, 0, 1, 1], [], []>} : vector<16x32xf32>, vector<32x32xf32>, vector<16x32xf32> -> vector<16x32xf32>
    %cst_61 = arith.constant dense<0.000000e+00> : vector<16x32xf32>
    %114 = tpu.matmul %112, %113, %cst_61 {dimension_numbers = #tpu.dot_dimension_numbers<[1], [0], [0], [1], [0, 0, 1, 1], [], []>} : vector<16x16xf32>, vector<16x32xf32>, vector<16x32xf32> -> vector<16x32xf32>
    %115 = arith.addf %95, %114 : vector<16x32xf32>
    %c4 = arith.constant 4 : index
    %c0_62 = arith.constant 0 : index
    %c0_63 = arith.constant 0 : index
    %116 = vector.load %arg6[%c4, %c0_62, %c0_63] : memref<16x32x32xf32, #tpu.memory_space<vmem>>, vector<1x32x32xf32>
    %117 = vector.shape_cast %116 : vector<1x32x32xf32> to vector<32x32xf32>
    %c5 = arith.constant 5 : index
    %c0_64 = arith.constant 0 : index
    %c0_65 = arith.constant 0 : index
    %118 = vector.load %arg6[%c5, %c0_64, %c0_65] : memref<16x32x32xf32, #tpu.memory_space<vmem>>, vector<1x32x32xf32>
    %119 = vector.shape_cast %118 : vector<1x32x32xf32> to vector<32x32xf32>
    %cst_66 = arith.constant dense<0.000000e+00> : vector<16x32xf32>
    %120 = tpu.matmul %76, %117, %cst_66 {dimension_numbers = #tpu.dot_dimension_numbers<[1], [0], [0], [1], [0, 0, 1, 1], [], []>} : vector<16x32xf32>, vector<32x32xf32>, vector<16x32xf32> -> vector<16x32xf32>
    %cst_67 = arith.constant dense<0.000000e+00> : vector<16x16xf32>
    %121 = tpu.matmul %120, %76, %cst_67 {dimension_numbers = #tpu.dot_dimension_numbers<[1], [1], [0], [0], [0, 0, 1, 0], [], []>} : vector<16x32xf32>, vector<16x32xf32>, vector<16x16xf32> -> vector<16x16xf32>
    %cst_68 = arith.constant -1.000000e+09 : f32
    %122 = vector.broadcast %cst_68 : f32 to vector<16x16xf32>
    %123 = arith.select %54, %121, %122 : vector<16x16xi1>, vector<16x16xf32>
    %cst_69 = arith.constant dense<0xFF800000> : vector<16xf32>
    %124 = vector.multi_reduction <maximumf>, %123, %cst_69 [1] : vector<16x16xf32> to vector<16xf32>
    %125 = vector.shape_cast %124 : vector<16xf32> to vector<16x1xf32>
    %126 = vector.broadcast %125 : vector<16x1xf32> to vector<16x16xf32>
    %127 = arith.subf %123, %126 : vector<16x16xf32>
    %128 = math.exp %127 : vector<16x16xf32>
    %cst_70 = arith.constant dense<0.000000e+00> : vector<16xf32>
    %129 = vector.multi_reduction <add>, %128, %cst_70 [1] : vector<16x16xf32> to vector<16xf32>
    %130 = vector.shape_cast %129 : vector<16xf32> to vector<16x1xf32>
    %131 = vector.broadcast %130 : vector<16x1xf32> to vector<16x16xf32>
    %132 = arith.divf %128, %131 : vector<16x16xf32>
    %cst_71 = arith.constant dense<0.000000e+00> : vector<16x32xf32>
    %133 = tpu.matmul %76, %119, %cst_71 {dimension_numbers = #tpu.dot_dimension_numbers<[1], [0], [0], [1], [0, 0, 1, 1], [], []>} : vector<16x32xf32>, vector<32x32xf32>, vector<16x32xf32> -> vector<16x32xf32>
    %cst_72 = arith.constant dense<0.000000e+00> : vector<16x32xf32>
    %134 = tpu.matmul %132, %133, %cst_72 {dimension_numbers = #tpu.dot_dimension_numbers<[1], [0], [0], [1], [0, 0, 1, 1], [], []>} : vector<16x16xf32>, vector<16x32xf32>, vector<16x32xf32> -> vector<16x32xf32>
    %135 = arith.addf %115, %134 : vector<16x32xf32>
    %c6 = arith.constant 6 : index
    %c0_73 = arith.constant 0 : index
    %c0_74 = arith.constant 0 : index
    %136 = vector.load %arg6[%c6, %c0_73, %c0_74] : memref<16x32x32xf32, #tpu.memory_space<vmem>>, vector<1x32x32xf32>
    %137 = vector.shape_cast %136 : vector<1x32x32xf32> to vector<32x32xf32>
    %c7 = arith.constant 7 : index
    %c0_75 = arith.constant 0 : index
    %c0_76 = arith.constant 0 : index
    %138 = vector.load %arg6[%c7, %c0_75, %c0_76] : memref<16x32x32xf32, #tpu.memory_space<vmem>>, vector<1x32x32xf32>
    %139 = vector.shape_cast %138 : vector<1x32x32xf32> to vector<32x32xf32>
    %cst_77 = arith.constant dense<0.000000e+00> : vector<16x32xf32>
    %140 = tpu.matmul %76, %137, %cst_77 {dimension_numbers = #tpu.dot_dimension_numbers<[1], [0], [0], [1], [0, 0, 1, 1], [], []>} : vector<16x32xf32>, vector<32x32xf32>, vector<16x32xf32> -> vector<16x32xf32>
    %cst_78 = arith.constant dense<0.000000e+00> : vector<16x16xf32>
    %141 = tpu.matmul %140, %76, %cst_78 {dimension_numbers = #tpu.dot_dimension_numbers<[1], [1], [0], [0], [0, 0, 1, 0], [], []>} : vector<16x32xf32>, vector<16x32xf32>, vector<16x16xf32> -> vector<16x16xf32>
    %cst_79 = arith.constant -1.000000e+09 : f32
    %142 = vector.broadcast %cst_79 : f32 to vector<16x16xf32>
    %143 = arith.select %54, %141, %142 : vector<16x16xi1>, vector<16x16xf32>
    %cst_80 = arith.constant dense<0xFF800000> : vector<16xf32>
    %144 = vector.multi_reduction <maximumf>, %143, %cst_80 [1] : vector<16x16xf32> to vector<16xf32>
    %145 = vector.shape_cast %144 : vector<16xf32> to vector<16x1xf32>
    %146 = vector.broadcast %145 : vector<16x1xf32> to vector<16x16xf32>
    %147 = arith.subf %143, %146 : vector<16x16xf32>
    %148 = math.exp %147 : vector<16x16xf32>
    %cst_81 = arith.constant dense<0.000000e+00> : vector<16xf32>
    %149 = vector.multi_reduction <add>, %148, %cst_81 [1] : vector<16x16xf32> to vector<16xf32>
    %150 = vector.shape_cast %149 : vector<16xf32> to vector<16x1xf32>
    %151 = vector.broadcast %150 : vector<16x1xf32> to vector<16x16xf32>
    %152 = arith.divf %148, %151 : vector<16x16xf32>
    %cst_82 = arith.constant dense<0.000000e+00> : vector<16x32xf32>
    %153 = tpu.matmul %76, %139, %cst_82 {dimension_numbers = #tpu.dot_dimension_numbers<[1], [0], [0], [1], [0, 0, 1, 1], [], []>} : vector<16x32xf32>, vector<32x32xf32>, vector<16x32xf32> -> vector<16x32xf32>
    %cst_83 = arith.constant dense<0.000000e+00> : vector<16x32xf32>
    %154 = tpu.matmul %152, %153, %cst_83 {dimension_numbers = #tpu.dot_dimension_numbers<[1], [0], [0], [1], [0, 0, 1, 1], [], []>} : vector<16x16xf32>, vector<16x32xf32>, vector<16x32xf32> -> vector<16x32xf32>
    %155 = arith.addf %135, %154 : vector<16x32xf32>
    %156 = arith.addf %51, %155 : vector<16x32xf32>
    %c11 = arith.constant 11 : index
    %c0_84 = arith.constant 0 : index
    %157 = vector.load %arg4[%c11, %c0_84] : memref<23x256xf32, #tpu.memory_space<vmem>>, vector<1x32xf32>
    %158 = vector.broadcast %157 : vector<1x32xf32> to vector<16x32xf32>
    %159 = arith.addf %156, %158 : vector<16x32xf32>
    %c12 = arith.constant 12 : index
    %c0_85 = arith.constant 0 : index
    %160 = vector.load %arg4[%c12, %c0_85] : memref<23x256xf32, #tpu.memory_space<vmem>>, vector<1x32xf32>
    %c13 = arith.constant 13 : index
    %c0_86 = arith.constant 0 : index
    %161 = vector.load %arg4[%c13, %c0_86] : memref<23x256xf32, #tpu.memory_space<vmem>>, vector<1x32xf32>
    %cst_87 = arith.constant dense<0.000000e+00> : vector<16xf32>
    %162 = vector.multi_reduction <add>, %159, %cst_87 [1] : vector<16x32xf32> to vector<16xf32>
    %163 = vector.shape_cast %162 : vector<16xf32> to vector<16x1xf32>
    %cst_88 = arith.constant 3.200000e+01 : f32
    %164 = vector.broadcast %cst_88 : f32 to vector<16x1xf32>
    %165 = arith.divf %163, %164 : vector<16x1xf32>
    %166 = vector.broadcast %165 : vector<16x1xf32> to vector<16x32xf32>
    %167 = arith.subf %159, %166 : vector<16x32xf32>
    %168 = arith.mulf %167, %167 : vector<16x32xf32>
    %cst_89 = arith.constant dense<0.000000e+00> : vector<16xf32>
    %169 = vector.multi_reduction <add>, %168, %cst_89 [1] : vector<16x32xf32> to vector<16xf32>
    %170 = vector.shape_cast %169 : vector<16xf32> to vector<16x1xf32>
    %cst_90 = arith.constant 3.200000e+01 : f32
    %171 = vector.broadcast %cst_90 : f32 to vector<16x1xf32>
    %172 = arith.divf %170, %171 : vector<16x1xf32>
    %cst_91 = arith.constant 9.99999974E-6 : f32
    %173 = vector.broadcast %cst_91 : f32 to vector<16x1xf32>
    %174 = arith.addf %172, %173 : vector<16x1xf32>
    %175 = math.rsqrt %174 : vector<16x1xf32>
    %176 = vector.broadcast %175 : vector<16x1xf32> to vector<16x32xf32>
    %177 = arith.mulf %167, %176 : vector<16x32xf32>
    %178 = vector.broadcast %160 : vector<1x32xf32> to vector<16x32xf32>
    %179 = arith.mulf %177, %178 : vector<16x32xf32>
    %180 = vector.broadcast %161 : vector<1x32xf32> to vector<16x32xf32>
    %181 = arith.addf %179, %180 : vector<16x32xf32>
    %c0_92 = arith.constant 0 : index
    %c0_93 = arith.constant 0 : index
    %c0_94 = arith.constant 0 : index
    %182 = vector.load %arg7[%c0_92, %c0_93, %c0_94] : memref<2x32x256xf32, #tpu.memory_space<vmem>>, vector<1x32x256xf32>
    %183 = vector.shape_cast %182 : vector<1x32x256xf32> to vector<32x256xf32>
    %cst_95 = arith.constant dense<0.000000e+00> : vector<16x256xf32>
    %184 = tpu.matmul %181, %183, %cst_95 {dimension_numbers = #tpu.dot_dimension_numbers<[1], [0], [0], [1], [0, 0, 1, 1], [], []>} : vector<16x32xf32>, vector<32x256xf32>, vector<16x256xf32> -> vector<16x256xf32>
    %c15 = arith.constant 15 : index
    %c0_96 = arith.constant 0 : index
    %185 = vector.load %arg4[%c15, %c0_96] : memref<23x256xf32, #tpu.memory_space<vmem>>, vector<1x256xf32>
    %186 = vector.broadcast %185 : vector<1x256xf32> to vector<16x256xf32>
    %187 = arith.addf %184, %186 : vector<16x256xf32>
    %188 = vector.extract_strided_slice %187 {offsets = [0, 0], sizes = [16, 128], strides = [1, 1]} : vector<16x256xf32> to vector<16x128xf32>
    %189 = vector.extract_strided_slice %187 {offsets = [0, 128], sizes = [16, 128], strides = [1, 1]} : vector<16x256xf32> to vector<16x128xf32>
    %190 = arith.mulf %189, %189 : vector<16x128xf32>
    %191 = arith.mulf %189, %190 : vector<16x128xf32>
    %cst_97 = arith.constant 4.471500e-02 : f32
    %192 = vector.broadcast %cst_97 : f32 to vector<16x128xf32>
    %193 = arith.mulf %192, %191 : vector<16x128xf32>
    %194 = arith.addf %189, %193 : vector<16x128xf32>
    %cst_98 = arith.constant 0.797884583 : f32
    %195 = vector.broadcast %cst_98 : f32 to vector<16x128xf32>
    %196 = arith.mulf %195, %194 : vector<16x128xf32>
    %197 = math.tanh %196 : vector<16x128xf32>
    %cst_99 = arith.constant 1.000000e+00 : f32
    %198 = vector.broadcast %cst_99 : f32 to vector<16x128xf32>
    %199 = arith.addf %198, %197 : vector<16x128xf32>
    %cst_100 = arith.constant 5.000000e-01 : f32
    %200 = vector.broadcast %cst_100 : f32 to vector<16x128xf32>
    %201 = arith.mulf %200, %199 : vector<16x128xf32>
    %202 = arith.mulf %189, %201 : vector<16x128xf32>
    %203 = arith.mulf %188, %202 : vector<16x128xf32>
    %c0_101 = arith.constant 0 : index
    %c0_102 = arith.constant 0 : index
    %c0_103 = arith.constant 0 : index
    %204 = vector.load %arg8[%c0_101, %c0_102, %c0_103] : memref<2x128x32xf32, #tpu.memory_space<vmem>>, vector<1x128x32xf32>
    %205 = vector.shape_cast %204 : vector<1x128x32xf32> to vector<128x32xf32>
    %cst_104 = arith.constant dense<0.000000e+00> : vector<16x32xf32>
    %206 = tpu.matmul %203, %205, %cst_104 {dimension_numbers = #tpu.dot_dimension_numbers<[1], [0], [0], [1], [0, 0, 1, 1], [], []>} : vector<16x128xf32>, vector<128x32xf32>, vector<16x32xf32> -> vector<16x32xf32>
    %207 = arith.addf %159, %206 : vector<16x32xf32>
    %c14 = arith.constant 14 : index
    %c0_105 = arith.constant 0 : index
    %208 = vector.load %arg4[%c14, %c0_105] : memref<23x256xf32, #tpu.memory_space<vmem>>, vector<1x32xf32>
    %209 = vector.broadcast %208 : vector<1x32xf32> to vector<16x32xf32>
    %210 = arith.addf %207, %209 : vector<16x32xf32>
    %c16_106 = arith.constant 16 : index
    %c0_107 = arith.constant 0 : index
    %211 = vector.load %arg4[%c16_106, %c0_107] : memref<23x256xf32, #tpu.memory_space<vmem>>, vector<1x32xf32>
    %c17 = arith.constant 17 : index
    %c0_108 = arith.constant 0 : index
    %212 = vector.load %arg4[%c17, %c0_108] : memref<23x256xf32, #tpu.memory_space<vmem>>, vector<1x32xf32>
    %cst_109 = arith.constant dense<0.000000e+00> : vector<16xf32>
    %213 = vector.multi_reduction <add>, %210, %cst_109 [1] : vector<16x32xf32> to vector<16xf32>
    %214 = vector.shape_cast %213 : vector<16xf32> to vector<16x1xf32>
    %cst_110 = arith.constant 3.200000e+01 : f32
    %215 = vector.broadcast %cst_110 : f32 to vector<16x1xf32>
    %216 = arith.divf %214, %215 : vector<16x1xf32>
    %217 = vector.broadcast %216 : vector<16x1xf32> to vector<16x32xf32>
    %218 = arith.subf %210, %217 : vector<16x32xf32>
    %219 = arith.mulf %218, %218 : vector<16x32xf32>
    %cst_111 = arith.constant dense<0.000000e+00> : vector<16xf32>
    %220 = vector.multi_reduction <add>, %219, %cst_111 [1] : vector<16x32xf32> to vector<16xf32>
    %221 = vector.shape_cast %220 : vector<16xf32> to vector<16x1xf32>
    %cst_112 = arith.constant 3.200000e+01 : f32
    %222 = vector.broadcast %cst_112 : f32 to vector<16x1xf32>
    %223 = arith.divf %221, %222 : vector<16x1xf32>
    %cst_113 = arith.constant 9.99999974E-6 : f32
    %224 = vector.broadcast %cst_113 : f32 to vector<16x1xf32>
    %225 = arith.addf %223, %224 : vector<16x1xf32>
    %226 = math.rsqrt %225 : vector<16x1xf32>
    %227 = vector.broadcast %226 : vector<16x1xf32> to vector<16x32xf32>
    %228 = arith.mulf %218, %227 : vector<16x32xf32>
    %229 = vector.broadcast %211 : vector<1x32xf32> to vector<16x32xf32>
    %230 = arith.mulf %228, %229 : vector<16x32xf32>
    %231 = vector.broadcast %212 : vector<1x32xf32> to vector<16x32xf32>
    %232 = arith.addf %230, %231 : vector<16x32xf32>
    %c8 = arith.constant 8 : index
    %c0_114 = arith.constant 0 : index
    %c0_115 = arith.constant 0 : index
    %233 = vector.load %arg6[%c8, %c0_114, %c0_115] : memref<16x32x32xf32, #tpu.memory_space<vmem>>, vector<1x32x32xf32>
    %234 = vector.shape_cast %233 : vector<1x32x32xf32> to vector<32x32xf32>
    %c9_116 = arith.constant 9 : index
    %c0_117 = arith.constant 0 : index
    %c0_118 = arith.constant 0 : index
    %235 = vector.load %arg6[%c9_116, %c0_117, %c0_118] : memref<16x32x32xf32, #tpu.memory_space<vmem>>, vector<1x32x32xf32>
    %236 = vector.shape_cast %235 : vector<1x32x32xf32> to vector<32x32xf32>
    %cst_119 = arith.constant dense<0.000000e+00> : vector<16x32xf32>
    %237 = tpu.matmul %232, %234, %cst_119 {dimension_numbers = #tpu.dot_dimension_numbers<[1], [0], [0], [1], [0, 0, 1, 1], [], []>} : vector<16x32xf32>, vector<32x32xf32>, vector<16x32xf32> -> vector<16x32xf32>
    %cst_120 = arith.constant dense<0.000000e+00> : vector<16x16xf32>
    %238 = tpu.matmul %237, %232, %cst_120 {dimension_numbers = #tpu.dot_dimension_numbers<[1], [1], [0], [0], [0, 0, 1, 0], [], []>} : vector<16x32xf32>, vector<16x32xf32>, vector<16x16xf32> -> vector<16x16xf32>
    %cst_121 = arith.constant -1.000000e+09 : f32
    %239 = vector.broadcast %cst_121 : f32 to vector<16x16xf32>
    %240 = arith.select %54, %238, %239 : vector<16x16xi1>, vector<16x16xf32>
    %cst_122 = arith.constant dense<0xFF800000> : vector<16xf32>
    %241 = vector.multi_reduction <maximumf>, %240, %cst_122 [1] : vector<16x16xf32> to vector<16xf32>
    %242 = vector.shape_cast %241 : vector<16xf32> to vector<16x1xf32>
    %243 = vector.broadcast %242 : vector<16x1xf32> to vector<16x16xf32>
    %244 = arith.subf %240, %243 : vector<16x16xf32>
    %245 = math.exp %244 : vector<16x16xf32>
    %cst_123 = arith.constant dense<0.000000e+00> : vector<16xf32>
    %246 = vector.multi_reduction <add>, %245, %cst_123 [1] : vector<16x16xf32> to vector<16xf32>
    %247 = vector.shape_cast %246 : vector<16xf32> to vector<16x1xf32>
    %248 = vector.broadcast %247 : vector<16x1xf32> to vector<16x16xf32>
    %249 = arith.divf %245, %248 : vector<16x16xf32>
    %cst_124 = arith.constant dense<0.000000e+00> : vector<16x32xf32>
    %250 = tpu.matmul %232, %236, %cst_124 {dimension_numbers = #tpu.dot_dimension_numbers<[1], [0], [0], [1], [0, 0, 1, 1], [], []>} : vector<16x32xf32>, vector<32x32xf32>, vector<16x32xf32> -> vector<16x32xf32>
    %cst_125 = arith.constant dense<0.000000e+00> : vector<16x32xf32>
    %251 = tpu.matmul %249, %250, %cst_125 {dimension_numbers = #tpu.dot_dimension_numbers<[1], [0], [0], [1], [0, 0, 1, 1], [], []>} : vector<16x16xf32>, vector<16x32xf32>, vector<16x32xf32> -> vector<16x32xf32>
    %c10_126 = arith.constant 10 : index
    %c0_127 = arith.constant 0 : index
    %c0_128 = arith.constant 0 : index
    %252 = vector.load %arg6[%c10_126, %c0_127, %c0_128] : memref<16x32x32xf32, #tpu.memory_space<vmem>>, vector<1x32x32xf32>
    %253 = vector.shape_cast %252 : vector<1x32x32xf32> to vector<32x32xf32>
    %c11_129 = arith.constant 11 : index
    %c0_130 = arith.constant 0 : index
    %c0_131 = arith.constant 0 : index
    %254 = vector.load %arg6[%c11_129, %c0_130, %c0_131] : memref<16x32x32xf32, #tpu.memory_space<vmem>>, vector<1x32x32xf32>
    %255 = vector.shape_cast %254 : vector<1x32x32xf32> to vector<32x32xf32>
    %cst_132 = arith.constant dense<0.000000e+00> : vector<16x32xf32>
    %256 = tpu.matmul %232, %253, %cst_132 {dimension_numbers = #tpu.dot_dimension_numbers<[1], [0], [0], [1], [0, 0, 1, 1], [], []>} : vector<16x32xf32>, vector<32x32xf32>, vector<16x32xf32> -> vector<16x32xf32>
    %cst_133 = arith.constant dense<0.000000e+00> : vector<16x16xf32>
    %257 = tpu.matmul %256, %232, %cst_133 {dimension_numbers = #tpu.dot_dimension_numbers<[1], [1], [0], [0], [0, 0, 1, 0], [], []>} : vector<16x32xf32>, vector<16x32xf32>, vector<16x16xf32> -> vector<16x16xf32>
    %cst_134 = arith.constant -1.000000e+09 : f32
    %258 = vector.broadcast %cst_134 : f32 to vector<16x16xf32>
    %259 = arith.select %54, %257, %258 : vector<16x16xi1>, vector<16x16xf32>
    %cst_135 = arith.constant dense<0xFF800000> : vector<16xf32>
    %260 = vector.multi_reduction <maximumf>, %259, %cst_135 [1] : vector<16x16xf32> to vector<16xf32>
    %261 = vector.shape_cast %260 : vector<16xf32> to vector<16x1xf32>
    %262 = vector.broadcast %261 : vector<16x1xf32> to vector<16x16xf32>
    %263 = arith.subf %259, %262 : vector<16x16xf32>
    %264 = math.exp %263 : vector<16x16xf32>
    %cst_136 = arith.constant dense<0.000000e+00> : vector<16xf32>
    %265 = vector.multi_reduction <add>, %264, %cst_136 [1] : vector<16x16xf32> to vector<16xf32>
    %266 = vector.shape_cast %265 : vector<16xf32> to vector<16x1xf32>
    %267 = vector.broadcast %266 : vector<16x1xf32> to vector<16x16xf32>
    %268 = arith.divf %264, %267 : vector<16x16xf32>
    %cst_137 = arith.constant dense<0.000000e+00> : vector<16x32xf32>
    %269 = tpu.matmul %232, %255, %cst_137 {dimension_numbers = #tpu.dot_dimension_numbers<[1], [0], [0], [1], [0, 0, 1, 1], [], []>} : vector<16x32xf32>, vector<32x32xf32>, vector<16x32xf32> -> vector<16x32xf32>
    %cst_138 = arith.constant dense<0.000000e+00> : vector<16x32xf32>
    %270 = tpu.matmul %268, %269, %cst_138 {dimension_numbers = #tpu.dot_dimension_numbers<[1], [0], [0], [1], [0, 0, 1, 1], [], []>} : vector<16x16xf32>, vector<16x32xf32>, vector<16x32xf32> -> vector<16x32xf32>
    %271 = arith.addf %251, %270 : vector<16x32xf32>
    %c12_139 = arith.constant 12 : index
    %c0_140 = arith.constant 0 : index
    %c0_141 = arith.constant 0 : index
    %272 = vector.load %arg6[%c12_139, %c0_140, %c0_141] : memref<16x32x32xf32, #tpu.memory_space<vmem>>, vector<1x32x32xf32>
    %273 = vector.shape_cast %272 : vector<1x32x32xf32> to vector<32x32xf32>
    %c13_142 = arith.constant 13 : index
    %c0_143 = arith.constant 0 : index
    %c0_144 = arith.constant 0 : index
    %274 = vector.load %arg6[%c13_142, %c0_143, %c0_144] : memref<16x32x32xf32, #tpu.memory_space<vmem>>, vector<1x32x32xf32>
    %275 = vector.shape_cast %274 : vector<1x32x32xf32> to vector<32x32xf32>
    %cst_145 = arith.constant dense<0.000000e+00> : vector<16x32xf32>
    %276 = tpu.matmul %232, %273, %cst_145 {dimension_numbers = #tpu.dot_dimension_numbers<[1], [0], [0], [1], [0, 0, 1, 1], [], []>} : vector<16x32xf32>, vector<32x32xf32>, vector<16x32xf32> -> vector<16x32xf32>
    %cst_146 = arith.constant dense<0.000000e+00> : vector<16x16xf32>
    %277 = tpu.matmul %276, %232, %cst_146 {dimension_numbers = #tpu.dot_dimension_numbers<[1], [1], [0], [0], [0, 0, 1, 0], [], []>} : vector<16x32xf32>, vector<16x32xf32>, vector<16x16xf32> -> vector<16x16xf32>
    %cst_147 = arith.constant -1.000000e+09 : f32
    %278 = vector.broadcast %cst_147 : f32 to vector<16x16xf32>
    %279 = arith.select %54, %277, %278 : vector<16x16xi1>, vector<16x16xf32>
    %cst_148 = arith.constant dense<0xFF800000> : vector<16xf32>
    %280 = vector.multi_reduction <maximumf>, %279, %cst_148 [1] : vector<16x16xf32> to vector<16xf32>
    %281 = vector.shape_cast %280 : vector<16xf32> to vector<16x1xf32>
    %282 = vector.broadcast %281 : vector<16x1xf32> to vector<16x16xf32>
    %283 = arith.subf %279, %282 : vector<16x16xf32>
    %284 = math.exp %283 : vector<16x16xf32>
    %cst_149 = arith.constant dense<0.000000e+00> : vector<16xf32>
    %285 = vector.multi_reduction <add>, %284, %cst_149 [1] : vector<16x16xf32> to vector<16xf32>
    %286 = vector.shape_cast %285 : vector<16xf32> to vector<16x1xf32>
    %287 = vector.broadcast %286 : vector<16x1xf32> to vector<16x16xf32>
    %288 = arith.divf %284, %287 : vector<16x16xf32>
    %cst_150 = arith.constant dense<0.000000e+00> : vector<16x32xf32>
    %289 = tpu.matmul %232, %275, %cst_150 {dimension_numbers = #tpu.dot_dimension_numbers<[1], [0], [0], [1], [0, 0, 1, 1], [], []>} : vector<16x32xf32>, vector<32x32xf32>, vector<16x32xf32> -> vector<16x32xf32>
    %cst_151 = arith.constant dense<0.000000e+00> : vector<16x32xf32>
    %290 = tpu.matmul %288, %289, %cst_151 {dimension_numbers = #tpu.dot_dimension_numbers<[1], [0], [0], [1], [0, 0, 1, 1], [], []>} : vector<16x16xf32>, vector<16x32xf32>, vector<16x32xf32> -> vector<16x32xf32>
    %291 = arith.addf %271, %290 : vector<16x32xf32>
    %c14_152 = arith.constant 14 : index
    %c0_153 = arith.constant 0 : index
    %c0_154 = arith.constant 0 : index
    %292 = vector.load %arg6[%c14_152, %c0_153, %c0_154] : memref<16x32x32xf32, #tpu.memory_space<vmem>>, vector<1x32x32xf32>
    %293 = vector.shape_cast %292 : vector<1x32x32xf32> to vector<32x32xf32>
    %c15_155 = arith.constant 15 : index
    %c0_156 = arith.constant 0 : index
    %c0_157 = arith.constant 0 : index
    %294 = vector.load %arg6[%c15_155, %c0_156, %c0_157] : memref<16x32x32xf32, #tpu.memory_space<vmem>>, vector<1x32x32xf32>
    %295 = vector.shape_cast %294 : vector<1x32x32xf32> to vector<32x32xf32>
    %cst_158 = arith.constant dense<0.000000e+00> : vector<16x32xf32>
    %296 = tpu.matmul %232, %293, %cst_158 {dimension_numbers = #tpu.dot_dimension_numbers<[1], [0], [0], [1], [0, 0, 1, 1], [], []>} : vector<16x32xf32>, vector<32x32xf32>, vector<16x32xf32> -> vector<16x32xf32>
    %cst_159 = arith.constant dense<0.000000e+00> : vector<16x16xf32>
    %297 = tpu.matmul %296, %232, %cst_159 {dimension_numbers = #tpu.dot_dimension_numbers<[1], [1], [0], [0], [0, 0, 1, 0], [], []>} : vector<16x32xf32>, vector<16x32xf32>, vector<16x16xf32> -> vector<16x16xf32>
    %cst_160 = arith.constant -1.000000e+09 : f32
    %298 = vector.broadcast %cst_160 : f32 to vector<16x16xf32>
    %299 = arith.select %54, %297, %298 : vector<16x16xi1>, vector<16x16xf32>
    %cst_161 = arith.constant dense<0xFF800000> : vector<16xf32>
    %300 = vector.multi_reduction <maximumf>, %299, %cst_161 [1] : vector<16x16xf32> to vector<16xf32>
    %301 = vector.shape_cast %300 : vector<16xf32> to vector<16x1xf32>
    %302 = vector.broadcast %301 : vector<16x1xf32> to vector<16x16xf32>
    %303 = arith.subf %299, %302 : vector<16x16xf32>
    %304 = math.exp %303 : vector<16x16xf32>
    %cst_162 = arith.constant dense<0.000000e+00> : vector<16xf32>
    %305 = vector.multi_reduction <add>, %304, %cst_162 [1] : vector<16x16xf32> to vector<16xf32>
    %306 = vector.shape_cast %305 : vector<16xf32> to vector<16x1xf32>
    %307 = vector.broadcast %306 : vector<16x1xf32> to vector<16x16xf32>
    %308 = arith.divf %304, %307 : vector<16x16xf32>
    %cst_163 = arith.constant dense<0.000000e+00> : vector<16x32xf32>
    %309 = tpu.matmul %232, %295, %cst_163 {dimension_numbers = #tpu.dot_dimension_numbers<[1], [0], [0], [1], [0, 0, 1, 1], [], []>} : vector<16x32xf32>, vector<32x32xf32>, vector<16x32xf32> -> vector<16x32xf32>
    %cst_164 = arith.constant dense<0.000000e+00> : vector<16x32xf32>
    %310 = tpu.matmul %308, %309, %cst_164 {dimension_numbers = #tpu.dot_dimension_numbers<[1], [0], [0], [1], [0, 0, 1, 1], [], []>} : vector<16x16xf32>, vector<16x32xf32>, vector<16x32xf32> -> vector<16x32xf32>
    %311 = arith.addf %291, %310 : vector<16x32xf32>
    %312 = arith.addf %210, %311 : vector<16x32xf32>
    %c18 = arith.constant 18 : index
    %c0_165 = arith.constant 0 : index
    %313 = vector.load %arg4[%c18, %c0_165] : memref<23x256xf32, #tpu.memory_space<vmem>>, vector<1x32xf32>
    %314 = vector.broadcast %313 : vector<1x32xf32> to vector<16x32xf32>
    %315 = arith.addf %312, %314 : vector<16x32xf32>
    %c19 = arith.constant 19 : index
    %c0_166 = arith.constant 0 : index
    %316 = vector.load %arg4[%c19, %c0_166] : memref<23x256xf32, #tpu.memory_space<vmem>>, vector<1x32xf32>
    %c20 = arith.constant 20 : index
    %c0_167 = arith.constant 0 : index
    %317 = vector.load %arg4[%c20, %c0_167] : memref<23x256xf32, #tpu.memory_space<vmem>>, vector<1x32xf32>
    %cst_168 = arith.constant dense<0.000000e+00> : vector<16xf32>
    %318 = vector.multi_reduction <add>, %315, %cst_168 [1] : vector<16x32xf32> to vector<16xf32>
    %319 = vector.shape_cast %318 : vector<16xf32> to vector<16x1xf32>
    %cst_169 = arith.constant 3.200000e+01 : f32
    %320 = vector.broadcast %cst_169 : f32 to vector<16x1xf32>
    %321 = arith.divf %319, %320 : vector<16x1xf32>
    %322 = vector.broadcast %321 : vector<16x1xf32> to vector<16x32xf32>
    %323 = arith.subf %315, %322 : vector<16x32xf32>
    %324 = arith.mulf %323, %323 : vector<16x32xf32>
    %cst_170 = arith.constant dense<0.000000e+00> : vector<16xf32>
    %325 = vector.multi_reduction <add>, %324, %cst_170 [1] : vector<16x32xf32> to vector<16xf32>
    %326 = vector.shape_cast %325 : vector<16xf32> to vector<16x1xf32>
    %cst_171 = arith.constant 3.200000e+01 : f32
    %327 = vector.broadcast %cst_171 : f32 to vector<16x1xf32>
    %328 = arith.divf %326, %327 : vector<16x1xf32>
    %cst_172 = arith.constant 9.99999974E-6 : f32
    %329 = vector.broadcast %cst_172 : f32 to vector<16x1xf32>
    %330 = arith.addf %328, %329 : vector<16x1xf32>
    %331 = math.rsqrt %330 : vector<16x1xf32>
    %332 = vector.broadcast %331 : vector<16x1xf32> to vector<16x32xf32>
    %333 = arith.mulf %323, %332 : vector<16x32xf32>
    %334 = vector.broadcast %316 : vector<1x32xf32> to vector<16x32xf32>
    %335 = arith.mulf %333, %334 : vector<16x32xf32>
    %336 = vector.broadcast %317 : vector<1x32xf32> to vector<16x32xf32>
    %337 = arith.addf %335, %336 : vector<16x32xf32>
    %c1_173 = arith.constant 1 : index
    %c0_174 = arith.constant 0 : index
    %c0_175 = arith.constant 0 : index
    %338 = vector.load %arg7[%c1_173, %c0_174, %c0_175] : memref<2x32x256xf32, #tpu.memory_space<vmem>>, vector<1x32x256xf32>
    %339 = vector.shape_cast %338 : vector<1x32x256xf32> to vector<32x256xf32>
    %cst_176 = arith.constant dense<0.000000e+00> : vector<16x256xf32>
    %340 = tpu.matmul %337, %339, %cst_176 {dimension_numbers = #tpu.dot_dimension_numbers<[1], [0], [0], [1], [0, 0, 1, 1], [], []>} : vector<16x32xf32>, vector<32x256xf32>, vector<16x256xf32> -> vector<16x256xf32>
    %c22 = arith.constant 22 : index
    %c0_177 = arith.constant 0 : index
    %341 = vector.load %arg4[%c22, %c0_177] : memref<23x256xf32, #tpu.memory_space<vmem>>, vector<1x256xf32>
    %342 = vector.broadcast %341 : vector<1x256xf32> to vector<16x256xf32>
    %343 = arith.addf %340, %342 : vector<16x256xf32>
    %344 = vector.extract_strided_slice %343 {offsets = [0, 0], sizes = [16, 128], strides = [1, 1]} : vector<16x256xf32> to vector<16x128xf32>
    %345 = vector.extract_strided_slice %343 {offsets = [0, 128], sizes = [16, 128], strides = [1, 1]} : vector<16x256xf32> to vector<16x128xf32>
    %346 = arith.mulf %345, %345 : vector<16x128xf32>
    %347 = arith.mulf %345, %346 : vector<16x128xf32>
    %cst_178 = arith.constant 4.471500e-02 : f32
    %348 = vector.broadcast %cst_178 : f32 to vector<16x128xf32>
    %349 = arith.mulf %348, %347 : vector<16x128xf32>
    %350 = arith.addf %345, %349 : vector<16x128xf32>
    %cst_179 = arith.constant 0.797884583 : f32
    %351 = vector.broadcast %cst_179 : f32 to vector<16x128xf32>
    %352 = arith.mulf %351, %350 : vector<16x128xf32>
    %353 = math.tanh %352 : vector<16x128xf32>
    %cst_180 = arith.constant 1.000000e+00 : f32
    %354 = vector.broadcast %cst_180 : f32 to vector<16x128xf32>
    %355 = arith.addf %354, %353 : vector<16x128xf32>
    %cst_181 = arith.constant 5.000000e-01 : f32
    %356 = vector.broadcast %cst_181 : f32 to vector<16x128xf32>
    %357 = arith.mulf %356, %355 : vector<16x128xf32>
    %358 = arith.mulf %345, %357 : vector<16x128xf32>
    %359 = arith.mulf %344, %358 : vector<16x128xf32>
    %c1_182 = arith.constant 1 : index
    %c0_183 = arith.constant 0 : index
    %c0_184 = arith.constant 0 : index
    %360 = vector.load %arg8[%c1_182, %c0_183, %c0_184] : memref<2x128x32xf32, #tpu.memory_space<vmem>>, vector<1x128x32xf32>
    %361 = vector.shape_cast %360 : vector<1x128x32xf32> to vector<128x32xf32>
    %cst_185 = arith.constant dense<0.000000e+00> : vector<16x32xf32>
    %362 = tpu.matmul %359, %361, %cst_185 {dimension_numbers = #tpu.dot_dimension_numbers<[1], [0], [0], [1], [0, 0, 1, 1], [], []>} : vector<16x128xf32>, vector<128x32xf32>, vector<16x32xf32> -> vector<16x32xf32>
    %363 = arith.addf %315, %362 : vector<16x32xf32>
    %c21 = arith.constant 21 : index
    %c0_186 = arith.constant 0 : index
    %364 = vector.load %arg4[%c21, %c0_186] : memref<23x256xf32, #tpu.memory_space<vmem>>, vector<1x32xf32>
    %365 = vector.broadcast %364 : vector<1x32xf32> to vector<16x32xf32>
    %366 = arith.addf %363, %365 : vector<16x32xf32>
    %c4_187 = arith.constant 4 : index
    %c0_188 = arith.constant 0 : index
    %367 = vector.load %arg4[%c4_187, %c0_188] : memref<23x256xf32, #tpu.memory_space<vmem>>, vector<1x32xf32>
    %c5_189 = arith.constant 5 : index
    %c0_190 = arith.constant 0 : index
    %368 = vector.load %arg4[%c5_189, %c0_190] : memref<23x256xf32, #tpu.memory_space<vmem>>, vector<1x32xf32>
    %cst_191 = arith.constant dense<0.000000e+00> : vector<16xf32>
    %369 = vector.multi_reduction <add>, %366, %cst_191 [1] : vector<16x32xf32> to vector<16xf32>
    %370 = vector.shape_cast %369 : vector<16xf32> to vector<16x1xf32>
    %cst_192 = arith.constant 3.200000e+01 : f32
    %371 = vector.broadcast %cst_192 : f32 to vector<16x1xf32>
    %372 = arith.divf %370, %371 : vector<16x1xf32>
    %373 = vector.broadcast %372 : vector<16x1xf32> to vector<16x32xf32>
    %374 = arith.subf %366, %373 : vector<16x32xf32>
    %375 = arith.mulf %374, %374 : vector<16x32xf32>
    %cst_193 = arith.constant dense<0.000000e+00> : vector<16xf32>
    %376 = vector.multi_reduction <add>, %375, %cst_193 [1] : vector<16x32xf32> to vector<16xf32>
    %377 = vector.shape_cast %376 : vector<16xf32> to vector<16x1xf32>
    %cst_194 = arith.constant 3.200000e+01 : f32
    %378 = vector.broadcast %cst_194 : f32 to vector<16x1xf32>
    %379 = arith.divf %377, %378 : vector<16x1xf32>
    %cst_195 = arith.constant 9.99999974E-6 : f32
    %380 = vector.broadcast %cst_195 : f32 to vector<16x1xf32>
    %381 = arith.addf %379, %380 : vector<16x1xf32>
    %382 = math.rsqrt %381 : vector<16x1xf32>
    %383 = vector.broadcast %382 : vector<16x1xf32> to vector<16x32xf32>
    %384 = arith.mulf %374, %383 : vector<16x32xf32>
    %385 = vector.broadcast %367 : vector<1x32xf32> to vector<16x32xf32>
    %386 = arith.mulf %384, %385 : vector<16x32xf32>
    %387 = vector.broadcast %368 : vector<1x32xf32> to vector<16x32xf32>
    %388 = arith.addf %386, %387 : vector<16x32xf32>
    %c6_196 = arith.constant 6 : index
    %c0_197 = arith.constant 0 : index
    %389 = vector.load %arg4[%c6_196, %c0_197] : memref<23x256xf32, #tpu.memory_space<vmem>>, vector<1x32xf32>
    %c7_198 = arith.constant 7 : index
    %c0_199 = arith.constant 0 : index
    %390 = vector.load %arg4[%c7_198, %c0_199] : memref<23x256xf32, #tpu.memory_space<vmem>>, vector<1x32xf32>
    %cst_200 = arith.constant dense<0.000000e+00> : vector<16xf32>
    %391 = vector.multi_reduction <add>, %388, %cst_200 [1] : vector<16x32xf32> to vector<16xf32>
    %392 = vector.shape_cast %391 : vector<16xf32> to vector<16x1xf32>
    %cst_201 = arith.constant 3.200000e+01 : f32
    %393 = vector.broadcast %cst_201 : f32 to vector<16x1xf32>
    %394 = arith.divf %392, %393 : vector<16x1xf32>
    %395 = vector.broadcast %394 : vector<16x1xf32> to vector<16x32xf32>
    %396 = arith.subf %388, %395 : vector<16x32xf32>
    %397 = arith.mulf %396, %396 : vector<16x32xf32>
    %cst_202 = arith.constant dense<0.000000e+00> : vector<16xf32>
    %398 = vector.multi_reduction <add>, %397, %cst_202 [1] : vector<16x32xf32> to vector<16xf32>
    %399 = vector.shape_cast %398 : vector<16xf32> to vector<16x1xf32>
    %cst_203 = arith.constant 3.200000e+01 : f32
    %400 = vector.broadcast %cst_203 : f32 to vector<16x1xf32>
    %401 = arith.divf %399, %400 : vector<16x1xf32>
    %cst_204 = arith.constant 9.99999974E-6 : f32
    %402 = vector.broadcast %cst_204 : f32 to vector<16x1xf32>
    %403 = arith.addf %401, %402 : vector<16x1xf32>
    %404 = math.rsqrt %403 : vector<16x1xf32>
    %405 = vector.broadcast %404 : vector<16x1xf32> to vector<16x32xf32>
    %406 = arith.mulf %396, %405 : vector<16x32xf32>
    %407 = vector.broadcast %389 : vector<1x32xf32> to vector<16x32xf32>
    %408 = arith.mulf %406, %407 : vector<16x32xf32>
    %409 = vector.broadcast %390 : vector<1x32xf32> to vector<16x32xf32>
    %410 = arith.addf %408, %409 : vector<16x32xf32>
    %c304 = arith.constant 304 : index
    %c0_205 = arith.constant 0 : index
    %411 = vector.load %arg5[%c304, %c0_205] : memref<336x128xf32, #tpu.memory_space<vmem>>, vector<32x16xf32>
    %cst_206 = arith.constant dense<0.000000e+00> : vector<16x16xf32>
    %412 = tpu.matmul %410, %411, %cst_206 {dimension_numbers = #tpu.dot_dimension_numbers<[1], [0], [0], [1], [0, 0, 1, 1], [], []>} : vector<16x32xf32>, vector<32x16xf32>, vector<16x16xf32> -> vector<16x16xf32>
    %c8_207 = arith.constant 8 : index
    %c0_208 = arith.constant 0 : index
    %413 = vector.load %arg4[%c8_207, %c0_208] : memref<23x256xf32, #tpu.memory_space<vmem>>, vector<1x16xf32>
    %414 = vector.broadcast %413 : vector<1x16xf32> to vector<16x16xf32>
    %415 = arith.addf %412, %414 : vector<16x16xf32>
    %c0_209 = arith.constant 0 : index
    %c0_210 = arith.constant 0 : index
    %416 = vector.load %arg9[%c0_209, %c0_210] : memref<16x16xf32, #tpu.memory_space<vmem>>, vector<16x16xf32>
    tpu.vector_store %arg9[%c0_209, %c0_210], %415 {strides = array<i32>} : memref<16x16xf32, #tpu.memory_space<vmem>>, vector<16x16xf32>,
    return
  }
}

</mosaic_0001>

<bundles_post_ra>
// kernel: diffusion_transformer_forward.1
= control target key start
LH: loop header
LB: loop body
LE: loop exit
PB: predicated region body
PF: predicated region fallthrough
CT: control target
= control target key end

     0   :  { %14 = vsyncpa [#allocation3], 0  ;;  %s6275_s0 = inlined_call_operand.vmem [shape: f32[16,16], index: 0, kind: input, shape index: {}]   ;;  %s6276_s1 = inlined_call_operand.vmem [shape: f32[16,32], index: 1, kind: input, shape index: {}]   ;;  %s6277_s2 = inlined_call_operand.vmem [shape: f32[16,16], index: 2, kind: input, shape index: {}]   ;;  %s6278_s3 = inlined_call_operand.vmem [shape: f32[64,32], index: 3, kind: input, shape index: {}]   ;;  %s6279_s4 = inlined_call_operand.hbm [shape: f32[23,256], index: 4, kind: input, shape index: {}]   ;;  %s6280_s5 = inlined_call_operand.hbm [shape: f32[336,128], index: 5, kind: input, shape index: {}]   ;;  %s6281_s6 = inlined_call_operand.vmem [shape: f32[16,32,32], index: 6, kind: input, shape index: {}]   ;;  %s6282_s7 = inlined_call_operand.hbm [shape: f32[2,32,256], index: 7, kind: input, shape index: {}]   ;;  %s6283_s8 = inlined_call_operand.vmem [shape: f32[2,128,32], index: 8, kind: input, shape index: {}]   ;;  %s6284_s9 = inlined_call_operand.hbm [shape: f32[16,16], index: 9, kind: output, shape index: {}]  }
   0x1   :  { %15 = vsyncpa [#allocation6], 0 }
   0x2   :  { %16 = vsyncpa [#allocation4], 0  ;;  %s5487_s30 = smov [#allocation5]   ;;  %s5393_s13 = scalar_lea.hbm %s6280_s5, 5376 }
   0x3   :  { %s42_s10 = sshll.u32 %s5487_s30, 4  ;;  %p5394_p0 = scmp.ne.s32.totalorder %s6280_s5, %s5393_s13  ;;  %s43_s10 = int_to_ptr.vmem [resolvable:$true] %s42_s10 }
   0x4   :  { %p5397_p1 = scmp.lt.u32.totalorder %s5393_s13, %s6280_s5 }
   0x6   :  { %p5399_p2 = pnand %p5397_p1, %p5394_p0 }
   0x8   :  { %5402 = shalt.err (!%p5399_p2)
}
   0x9   :  { %s5403_s18 = scalar_lea.vmem %s43_s10, 5376  ;;  %p5408_p4 = scmp.lt.s32.totalorder %s43_s10, %s43_s10 }
   0xa   :  { %p5404_p3 = scmp.ne.s32.totalorder %s43_s10, %s5403_s18  ;;  %p5409_p5 = scmp.lt.s32.totalorder %s5403_s18, %s5403_s18 }
   0xc   :  { %p5410_p6 = por %p5409_p5, %p5408_p4 }
   0xe   :  { %p5411_p7 = pnand %p5410_p6, %p5404_p3 }
  0x10   :  { %5414 = shalt.err (!%p5411_p7)
}
  0x11   :  { %s5488_s19 = smov 128   ;;  %s5489_s20 = smov 8  }
  0x12   :  { %48 = dma.hbm_to_vmem [thread:$0]  %s6280_s5, 5376, %s43_s10, [#allocation6], %s5488_s19, %s5488_s19, %s5489_s20  }
  0x13   :  { %s5490_s23 = smov [#allocation2]   ;;  %s5415_s27 = scalar_lea.hbm %s6279_s4, 768 }
  0x14   :  { %s30_s24 = sshll.u32 %s5490_s23, 4  ;;  %p5416_p8 = scmp.ne.s32.totalorder %s6279_s4, %s5415_s27  ;;  %s31_s24 = int_to_ptr.vmem [resolvable:$true] %s30_s24 }
  0x15   :  { %p5419_p9 = scmp.lt.u32.totalorder %s5415_s27, %s6279_s4 }
  0x17   :  { %p5421_p10 = pnand %p5419_p9, %p5416_p8 }
  0x19   :  { %5424 = shalt.err (!%p5421_p10)
}
  0x1a   :  { %s5425_s12 = scalar_lea.vmem %s31_s24, 768  ;;  %p5430_p12 = scmp.lt.s32.totalorder %s31_s24, %s31_s24 }
  0x1b   :  { %p5426_p11 = scmp.ne.s32.totalorder %s31_s24, %s5425_s12  ;;  %p5431_p13 = scmp.lt.s32.totalorder %s5425_s12, %s5425_s12 }
  0x1d   :  { %p5432_p0 = por %p5431_p13, %p5430_p12 }
  0x1f   :  { %p5433_p1 = pnand %p5432_p0, %p5426_p11 }
  0x21   :  { %5436 = shalt.err (!%p5433_p1)
}
  0x22   :  { %s5491_s5 = smov 256   ;;  %s5492_s10 = smov 16  }
  0x23   :  { %36 = dma.hbm_to_vmem [thread:$0]  %s6279_s4, 768, %s31_s24, [#allocation3], %s5491_s5, %s5491_s5, %s5492_s10  }
  0x24   :  { %s5493_s15 = smov [#allocation7]   ;;  %s5437_s21 = scalar_lea.hbm %s6282_s7, 2048 }
  0x25   :  { %s56_s16 = sshll.u32 %s5493_s15, 4  ;;  %p5438_p2 = scmp.ne.s32.totalorder %s6282_s7, %s5437_s21  ;;  %s57_s16 = int_to_ptr.vmem [resolvable:$true] %s56_s16 }
  0x26   :  { %p5441_p3 = scmp.lt.u32.totalorder %s5437_s21, %s6282_s7 }
  0x28   :  { %p5443_p4 = pnand %p5441_p3, %p5438_p2 }
  0x2a   :  { %5446 = shalt.err (!%p5443_p4)
}
  0x2b   :  { %s5447_s27 = scalar_lea.vmem %s57_s16, 2048  ;;  %p5452_p6 = scmp.lt.s32.totalorder %s57_s16, %s57_s16 }
  0x2c   :  { %p5448_p5 = scmp.ne.s32.totalorder %s57_s16, %s5447_s27  ;;  %p5453_p7 = scmp.lt.s32.totalorder %s5447_s27, %s5447_s27 }
  0x2e   :  { %p5454_p8 = por %p5453_p7, %p5452_p6 }
  0x30   :  { %p5455_p9 = pnand %p5454_p8, %p5448_p5 }
  0x32   :  { %5458 = shalt.err (!%p5455_p9)
}
  0x33   :  { %62 = dma.hbm_to_vmem [thread:$0]  %s6282_s7, 2048, %s57_s16, [#allocation6], %s5491_s5, %s5491_s5, %s5492_s10  }
  0x34   :  { %5481 = dma.done.wait [#allocation3], 768  }
  0x35   :  { %5482 = vsyncadd [#allocation3], 4294966528 }
  0x36   :  { %5483 = dma.done.wait [#allocation6], 7424  }
  0x37   :  { %5484 = vsyncadd [#allocation6], 4294959872  ;;  %vm81_vm0 = vcmask 261120   ;;  %v76_v0 = vld [vmem:[#allocation5 + $0x10] sm:$0xff]  ;;  %v77_v1 = vld [vmem:[#allocation5 + $0x18] sm:$0xff]  ;;  %vm389_vm1 = vcmask 130048  }
  0x38   :  { %v78_v2 = vld [vmem:[#allocation5 + $0x20] sm:$0xff]  ;;  %v4888_v3 = vpack.c.bf16 %v77_v1, %v76_v0  ;;  %v79_v4 = vld [vmem:[#allocation5 + $0x28] sm:$0xff]  ;;  %v74_v5 = vld [vmem:[%s6276_s1] sm:$0xff] }
  0x39   :  { %v4892_v6 = vpack.c.bf16 %v79_v4, %v78_v2  ;;  %4439 = vmatprep.mubr.msk.f32.mxu1 %vm81_vm0, %v74_v5  ;;  %v75_v7 = vld [vmem:[%s6276_s1 + $0x8] sm:$0xff]  ;;  %v181_v8 = vld [vmem:[#allocation5 + $0x30] sm:$0xff]  ;;  %v183_v11 = vld [vmem:[#allocation5 + $0x40] sm:$0xff] }
  0x3a   :  { %4889 = vmatprep.subr.bf16.mxu1 %v4888_v3  ;;  %v182_v9 = vld [vmem:[#allocation5 + $0x38] sm:$0xff]  ;;  %v184_v12 = vld [vmem:[#allocation5 + $0x48] sm:$0xff]  ;;  %v185_v14 = vld [vmem:[#allocation5 + $0x50] sm:$0xff] }
  0x3b   :  { %4891 = vmatpush3.bf16.msra.mxu1 %v4888_v3  ;;  %v4896_v10 = vpack.c.bf16 %v182_v9, %v181_v8  ;;  %v4900_v13 = vpack.c.bf16 %v184_v12, %v183_v11  ;;  %v186_v15 = vld [vmem:[#allocation5 + $0x58] sm:$0xff]  ;;  %v187_v17 = vld [vmem:[#allocation5 + $0x60] sm:$0xff]  ;;  %v188_v18 = vld [vmem:[#allocation5 + $0x68] sm:$0xff] }
  0x3c   :  { %4893 = vmatprep.subr.bf16.mxu1 %v4892_v6  ;;  %v4904_v16 = vpack.c.bf16 %v186_v15, %v185_v14  ;;  %v4908_v19 = vpack.c.bf16 %v188_v18, %v187_v17  ;;  %v189_v20 = vld [vmem:[#allocation5 + $0x70] sm:$0xff]  ;;  %v190_v21 = vld [vmem:[#allocation5 + $0x78] sm:$0xff]  ;;  %v191_v22 = vld [vmem:[#allocation5 + $0x80] sm:$0xff] }
  0x3d   :  { %v4912_v23 = vpack.c.bf16 %v190_v21, %v189_v20  ;;  %v192_v24 = vld [vmem:[#allocation5 + $0x88] sm:$0xff]  ;;  %v193_v26 = vld [vmem:[#allocation5 + $0x90] sm:$0xff]  ;;  %v194_v27 = vld [vmem:[#allocation5 + $0x98] sm:$0xff] }
  0x3e   :  { %v4916_v25 = vpack.c.bf16 %v192_v24, %v191_v22  ;;  %v4920_v28 = vpack.c.bf16 %v194_v27, %v193_v26  ;;  %v195_v29 = vld [vmem:[#allocation5 + $0xa0] sm:$0xff]  ;;  %v196_v30 = vld [vmem:[#allocation5 + $0xa8] sm:$0xff]  ;;  %v291_v32 = vld [vmem:[#allocation5 + $0xb0] sm:$0xff] }
  0x3f   :  { %4895 = vmatpush3.bf16.msra.mxu1 %v4892_v6  ;;  %v4924_v31 = vpack.c.bf16 %v196_v30, %v195_v29  ;;  %v292_v33 = vld [vmem:[#allocation5 + $0xb8] sm:$0xff]  ;;  %v80_v35 = vld [vmem:[#allocation2 + $0x2] ss:$0 sm:$0xff]  ;;  %v293_v58 = vld [vmem:[#allocation5 + $0xc0] sm:$0xff] }
  0x40   :  { %4897 = vmatprep.subr.bf16.mxu1 %v4896_v10  ;;  %v4928_v34 = vpack.c.bf16 %v292_v33, %v291_v32  ;;  %v294_v59 = vld [vmem:[#allocation5 + $0xc8] sm:$0xff]  ;;  %v295_v61 = vld [vmem:[#allocation5 + $0xd0] sm:$0xff]  ;;  %v296_v62 = vld [vmem:[#allocation5 + $0xd8] sm:$0xff] }
  0x41   :  { %v4932_v60 = vpack.c.bf16 %v294_v59, %v293_v58  ;;  %v4936_v63 = vpack.c.bf16 %v296_v62, %v295_v61  ;;  %v297_v0 = vld [vmem:[#allocation5 + $0xe0] sm:$0xff]  ;;  %v298_v1 = vld [vmem:[#allocation5 + $0xe8] sm:$0xff]  ;;  %v299_v3 = vld [vmem:[#allocation5 + $0xf0] sm:$0xff] }
  0x42   :  { %4440 = vmatmul.mubr.msk.f32.vlgmr.msra.gmra.mrb[0].mxu1 %vm81_vm0, %v75_v7  ;;  %4929 = vmatprep.subr.bf16.mxu0 %v4928_v34  ;;  %v4940_v2 = vpack.c.bf16 %v298_v1, %v297_v0  ;;  %v300_v4 = vld [vmem:[#allocation5 + $0xf8] sm:$0xff]  ;;  %v301_v5 = vld [vmem:[#allocation5 + $0x100] sm:$0xff]  ;;  %v302_v7 = vld [vmem:[#allocation5 + $0x108] sm:$0xff] }
  0x43   :  { %4899 = vmatpush3.bf16.msra.mxu1 %v4896_v10  ;;  %4931 = vmatpush3.bf16.msra.mxu0 %v4928_v34  ;;  %v4944_v6 = vpack.c.bf16 %v300_v4, %v299_v3  ;;  %v4948_v8 = vpack.c.bf16 %v302_v7, %v301_v5  ;;  %v303_v9 = vld [vmem:[#allocation5 + $0x110] sm:$0xff]  ;;  %v304_v10 = vld [vmem:[#allocation5 + $0x118] sm:$0xff]  ;;  %v305_v12 = vld [vmem:[#allocation5 + $0x120] sm:$0xff] }
  0x44   :  { %4901 = vmatprep.subr.bf16.mxu1 %v4900_v13  ;;  %4933 = vmatprep.subr.bf16.mxu0 %v4932_v60  ;;  %v4952_v11 = vpack.c.bf16 %v304_v10, %v303_v9  ;;  %v386_v15 = vld [vmem:[#allocation5] sm:$0xff]  ;;  %v197_v18 = vld [vmem:[#allocation2 + $0x3] ss:$0 sm:$0xff]  ;;  %v4022_v5 = vld [vmem:[%s6281_s6 + $0x28] sm:$0xff] }
  0x45   :  { %v512_v1 = vld [vmem:[%s6281_s6] sm:$0xff]  ;;  %v514_v7 = vld [vmem:[%s6281_s6 + $0x10] sm:$0xff]  ;;  %vm5650_vm2 = vmpackc.low %vm81_vm0, %vm81_vm0 }
  0x46   :  { %v4021_v3 = vld [vmem:[%s6281_s6 + $0x20] sm:$0xff]  ;;  %v4023_v9 = vld [vmem:[%s6281_s6 + $0x30] sm:$0xff] }
  0x47   :  { %4903 = vmatpush3.bf16.msra.mxu1 %v4900_v13  ;;  %4935 = vmatpush3.bf16.msra.mxu0 %v4932_v60  ;;  %v306_v13 = vld [vmem:[#allocation5 + $0x128] sm:$0xff] }
  0x48   :  { %4905 = vmatprep.subr.bf16.mxu1 %v4904_v16  ;;  %4937 = vmatprep.subr.bf16.mxu0 %v4936_v63  ;;  %v4956_v14 = vpack.c.bf16 %v306_v13, %v305_v12 }
  0x4b   :  { %4907 = vmatpush3.bf16.msra.mxu1 %v4904_v16  ;;  %4939 = vmatpush3.bf16.msra.mxu0 %v4936_v63  ;;  %v387_v16 = vld [vmem:[#allocation5 + $0x8] sm:$0xff] }
  0x4c   :  { %4909 = vmatprep.subr.bf16.mxu1 %v4908_v19  ;;  %4941 = vmatprep.subr.bf16.mxu0 %v4940_v2  ;;  %v4960_v17 = vpack.c.bf16 %v387_v16, %v386_v15 }
  0x4f   :  { %4911 = vmatpush3.bf16.msra.mxu1 %v4908_v19  ;;  %4943 = vmatpush3.bf16.msra.mxu0 %v4940_v2  ;;  %v513_v2 = vld [vmem:[%s6281_s6 + $0x8] sm:$0xff] }
  0x50   :  { %4913 = vmatprep.subr.bf16.mxu1 %v4912_v23  ;;  %4945 = vmatprep.subr.bf16.mxu0 %v4944_v6  ;;  %v4964_v4 = vpack.c.bf16 %v513_v2, %v512_v1 }
  0x53   :  { %4915 = vmatpush3.bf16.msra.mxu1 %v4912_v23  ;;  %4947 = vmatpush3.bf16.msra.mxu0 %v4944_v6  ;;  %v4978_v6 = vpack.c.bf16 %v4022_v5, %v4021_v3 }
  0x54   :  { %4917 = vmatprep.subr.bf16.mxu1 %v4916_v25  ;;  %4949 = vmatprep.subr.bf16.mxu0 %v4948_v8 }
  0x57   :  { %4919 = vmatpush3.bf16.msra.mxu1 %v4916_v25  ;;  %4951 = vmatpush3.bf16.msra.mxu0 %v4948_v8  ;;  %v515_v8 = vld [vmem:[%s6281_s6 + $0x18] sm:$0xff] }
  0x58   :  { %4921 = vmatprep.subr.bf16.mxu1 %v4920_v28  ;;  %4953 = vmatprep.subr.bf16.mxu0 %v4952_v11  ;;  %v4968_v10 = vpack.c.bf16 %v515_v8, %v514_v7 }
  0x5b   :  { %4923 = vmatpush3.bf16.msra.mxu1 %v4920_v28  ;;  %4955 = vmatpush3.bf16.msra.mxu0 %v4952_v11  ;;  %v4024_v11 = vld [vmem:[%s6281_s6 + $0x38] sm:$0xff] }
  0x5c   :  { %4925 = vmatprep.subr.bf16.mxu1 %v4924_v31  ;;  %4957 = vmatprep.subr.bf16.mxu0 %v4956_v14  ;;  %v4982_v12 = vpack.c.bf16 %v4024_v11, %v4023_v9  ;;  %v5765_v11 = vld [vmem:[%s6275_s0] sm:$0xff] }
  0x5d   :  { %vm477_vm4 = vcmp.gt.f32.partialorder %v5765_v11, 0.0 }
  0x5f   :  { %4927 = vmatpush3.bf16.msra.mxu1 %v4924_v31  ;;  %4959 = vmatpush3.bf16.msra.mxu0 %v4956_v14 }
  0x60   :  { %4961 = vmatprep.subr.bf16.mxu0 %v4960_v17  ;;  %4965 = vmatprep.subr.bf16.mxu1 %v4964_v4 }
 0x115   :  { %v4441_v36 = vpop.f32.mrb[0].mxu1 }
 0x116   :  { %v160_v37 = vadd.f32 %v4441_v36, %v80_v35  ;;  %v154_v38 = vpop.f32.mrb[1].mxu1 }
 0x117   :  { %v155_v39 = vadd.f32 %v154_v38, %v80_v35 }
 0x118   :  { %v164_v40 = vmul.f32 %v160_v37, %v160_v37 }
 0x119   :  { %v163_v41 = vmul.f32 %v155_v39, %v155_v39 }
 0x11a   :  { %v166_v42 = vmul.f32 %v164_v40, %v160_v37 }
 0x11b   :  { %v165_v43 = vmul.f32 %v163_v41, %v155_v39  ;;  %v384_v41 = vld [vmem:[%s6277_s2] sm:$0xff] }
 0x11c   :  { %v168_v44 = vmul.f32 0.044715, %v166_v42  ;;  %v385_v42 = vld [vmem:[%s6277_s2 + $0x8] sm:$0xff] }
 0x11d   :  { %v167_v45 = vmul.f32 0.044715, %v165_v43  ;;  %v307_v43 = vld [vmem:[#allocation2 + $0x1] ss:$0 sm:$0xff] }
 0x11e   :  { %v170_v46 = vadd.f32 %v168_v44, %v160_v37  ;;  %v383_v44 = vld [vmem:[%s6278_s3] sm:$0xff] }
 0x11f   :  { %v169_v47 = vadd.f32 %v167_v45, %v155_v39  ;;  %v5263_v45 = vadd.f32 %v383_v44, %v307_v43  ;;  %v4038_v43 = vld [vmem:[%s6281_s6 + $0x68] sm:$0xff] }
 0x120   :  { %v172_v48 = vmul.f32 0.7978846, %v170_v46 }
 0x121   :  { %v171_v49 = vmul.f32 0.7978846, %v169_v47  ;;  %v388_v47 = vld [vmem:[#allocation2] ss:$0 sm:$0xff] }
 0x122   :  { %5289 = vtanh.f32 %v172_v48 }
 0x123   :  { %5291 = vtanh.f32 %v171_v49 }
 0x12c   :  { %v5290_v50 = vpop.eup %5289 }
 0x12d   :  { %v5292_v51 = vpop.eup %5291  ;;  %v176_v52 = vadd.f32 1.0, %v5290_v50 }
 0x12e   :  { %v175_v53 = vadd.f32 1.0, %v5292_v51 }
 0x12f   :  { %v178_v54 = vmul.f32 0.5, %v176_v52 }
 0x130   :  { %v177_v55 = vmul.f32 0.5, %v175_v53 }
 0x131   :  { %v180_v57 = vmul.f32 %v178_v54, %v160_v37 }
 0x132   :  { %v179_v56 = vmul.f32 %v177_v55, %v155_v39 }
 0x134   :  { %4474 = vmatprep.mubr.f32.mxu1 %v179_v56 }
 0x135   :  { %4475 = vmatmul.mubr.f32.vlgmr.msra.gmra.mrb[2].mxu1 %v180_v57 }
 0x136   :  { %4967 = vmatpush3.bf16.msra.mxu1 %v4964_v4 }
 0x137   :  { %4969 = vmatprep.subr.bf16.mxu1 %v4968_v10 }
 0x13a   :  { %4971 = vmatpush3.bf16.msra.mxu1 %v4968_v10  ;;  %v5760_v10 = vld [vmem:[%s6275_s0 + $0x8] sm:$0xff] }
 0x13b   :  { %vm478_vm3 = vcmp.gt.f32.partialorder %v5760_v10, 0.0 }
 0x208   :  { %v4476_v19 = vpop.f32.mrb[2].mxu1 }
 0x209   :  { %v270_v20 = vadd.f32 %v4476_v19, %v197_v18  ;;  %v264_v21 = vpop.f32.mrb[3].mxu1 }
 0x20a   :  { %v265_v22 = vadd.f32 %v264_v21, %v197_v18 }
 0x20b   :  { %v274_v23 = vmul.f32 %v270_v20, %v270_v20 }
 0x20c   :  { %v273_v24 = vmul.f32 %v265_v22, %v265_v22 }
 0x20d   :  { %v276_v25 = vmul.f32 %v274_v23, %v270_v20 }
 0x20e   :  { %v275_v26 = vmul.f32 %v273_v24, %v265_v22 }
 0x20f   :  { %v278_v27 = vmul.f32 0.044715, %v276_v25 }
 0x210   :  { %v277_v28 = vmul.f32 0.044715, %v275_v26 }
 0x211   :  { %v280_v29 = vadd.f32 %v278_v27, %v270_v20 }
 0x212   :  { %v279_v30 = vadd.f32 %v277_v28, %v265_v22 }
 0x213   :  { %v282_v31 = vmul.f32 0.7978846, %v280_v29 }
 0x214   :  { %v281_v32 = vmul.f32 0.7978846, %v279_v30 }
 0x215   :  { %5293 = vtanh.f32 %v282_v31  ;;  %v4033_v31 = vld [vmem:[%s6281_s6 + $0x40] sm:$0xff] }
 0x216   :  { %5295 = vtanh.f32 %v281_v32  ;;  %v4034_v32 = vld [vmem:[%s6281_s6 + $0x48] sm:$0xff] }
 0x21f   :  { %v5294_v33 = vpop.eup %5293 }
 0x220   :  { %v5296_v34 = vpop.eup %5295  ;;  %v286_v35 = vadd.f32 1.0, %v5294_v33  ;;  %v4986_v33 = vpack.c.bf16 %v4034_v32, %v4033_v31 }
 0x221   :  { %v285_v36 = vadd.f32 1.0, %v5296_v34  ;;  %v4035_v34 = vld [vmem:[%s6281_s6 + $0x50] sm:$0xff] }
 0x222   :  { %v288_v37 = vmul.f32 0.5, %v286_v35  ;;  %v4036_v35 = vld [vmem:[%s6281_s6 + $0x58] sm:$0xff] }
 0x223   :  { %v287_v38 = vmul.f32 0.5, %v285_v36 }
 0x224   :  { %v290_v40 = vmul.f32 %v288_v37, %v270_v20  ;;  %v479_v20 = vld [vmem:[#allocation2 + $0x11] ss:$0 sm:$0xff] }
 0x225   :  { %v289_v39 = vmul.f32 %v287_v38, %v265_v22  ;;  %v480_v22 = vld [vmem:[#allocation2 + $0x12] ss:$0 sm:$0xff] }
 0x227   :  { %4509 = vmatprep.mubr.f32.mxu0 %v289_v39 }
 0x228   :  { %4510 = vmatmul.mubr.f32.vlgmr.msra.gmra.mrb[0].mxu0 %v290_v40  ;;  %v4990_v40 = vpack.c.bf16 %v4036_v35, %v4035_v34 }
 0x229   :  { %4963 = vmatpush3.bf16.msra.mxu0 %v4960_v17  ;;  %4516 = vmatprep.mubr.msk.f32.mxu0 %vm389_vm1, %v384_v41 }
 0x22a   :  { %4979 = vmatprep.subr.bf16.mxu0 %v4978_v6 }
 0x230   :  { %4517 = vmatmul.mubr.msk.f32.vlgmr.msra.gmra.mrb[0].mxu0 %vm389_vm1, %v385_v42  ;;  %v4037_v42 = vld [vmem:[%s6281_s6 + $0x60] sm:$0xff] }
 0x231   :  { %4981 = vmatpush3.bf16.msra.mxu0 %v4978_v6  ;;  %v5000_v44 = vpack.c.bf16 %v4038_v43, %v4037_v42 }
 0x232   :  { %4983 = vmatprep.subr.bf16.mxu0 %v4982_v12 }
 0x235   :  { %4985 = vmatpush3.bf16.msra.mxu0 %v4982_v12 }
 0x303   :  { %v4518_v46 = vpop.f32.mrb[0].mxu0 }
 0x304   :  { %v462_v48 = vpop.f32.mrb[1].mxu0  ;;  %v5261_v49 = vadd.f32 %v5263_v45, %v4518_v46  ;;  %v4040_v46 = vld [vmem:[%s6281_s6 + $0x78] sm:$0xff] }
 0x305   :  { %v5264_v50 = vadd.f32 %v5263_v45, %v462_v48  ;;  %v4039_v45 = vld [vmem:[%s6281_s6 + $0x70] sm:$0xff]  ;;  %v4053_v48 = vld [vmem:[%s6281_s6 + $0x80] sm:$0xff] }
 0x306   :  { %v5606_v52 = vadd.f32 %v5261_v49, %v388_v47  ;;  %v4054_v49 = vld [vmem:[%s6281_s6 + $0x88] sm:$0xff] }
 0x307   :  { %v5604_v51 = vadd.f32 %v5264_v50, %v388_v47  ;;  %v5004_v47 = vpack.c.bf16 %v4040_v46, %v4039_v45  ;;  %v5016_v50 = vpack.c.bf16 %v4054_v49, %v4053_v48 }
 0x308   :  { %v484_v54 = vsel %vm81_vm0, %v5606_v52, 0.0 }
 0x309   :  { %v481_v53 = vsel %vm81_vm0, %v5604_v51, 0.0 }
 0x30a   :  { %482 = vadd.xlane.f32.xlu0 %v481_v53  ;;  %v4055_v53 = vld [vmem:[%s6281_s6 + $0x90] sm:$0xff] }
 0x30e   :  { %485 = vadd.xlane.f32.xlu0 %v484_v54  ;;  %v4056_v54 = vld [vmem:[%s6281_s6 + $0x98] sm:$0xff] }
 0x397   :  { %v483_v55 = vpop.xlane.xlu0 %482 }
 0x398   :  { %v488_v56 = vmul.f32 0.03125, %v483_v55  ;;  %v5020_v55 = vpack.c.bf16 %v4056_v54, %v4055_v53 }
 0x39a   :  { %v490_v57 = vsub.f32 %v5604_v51, %v488_v56  ;;  %v4057_v56 = vld [vmem:[%s6281_s6 + $0xa0] sm:$0xff] }
 0x39b   :  { %v486_v58 = vpop.xlane.xlu0 %485 }
 0x39c   :  { %v489_v59 = vmul.f32 0.03125, %v486_v58  ;;  %v492_v60 = vmul.f32 %v490_v57, %v490_v57 }
 0x39e   :  { %v491_v61 = vsub.f32 %v5606_v52, %v489_v59  ;;  %v494_v62 = vsel %vm81_vm0, %v492_v60, 0.0  ;;  %v4059_v59 = vld [vmem:[%s6281_s6 + $0xb0] sm:$0xff]  ;;  %v4060_v60 = vld [vmem:[%s6281_s6 + $0xb8] sm:$0xff] }
 0x39f   :  { %495 = vadd.xlane.f32.xlu1 %v494_v62 }
 0x3a0   :  { %v493_v63 = vmul.f32 %v491_v61, %v491_v61 }
 0x3a2   :  { %v497_v0 = vsel %vm81_vm0, %v493_v63, 0.0 }
 0x3a3   :  { %498 = vadd.xlane.f32.xlu1 %v497_v0 }
 0x42c   :  { %v496_v13 = vpop.xlane.xlu1 %495 }
 0x42d   :  { %v500_v14 = vmul.f32 0.03125, %v496_v13 }
 0x42f   :  { %v502_v15 = vadd.f32 1e-05, %v500_v14 }
 0x430   :  { %v499_v16 = vpop.xlane.xlu1 %498 }
 0x431   :  { %5297 = vrsqrt.f32 %v502_v15  ;;  %v501_v17 = vmul.f32 0.03125, %v499_v16 }
 0x433   :  { %v503_v18 = vadd.f32 1e-05, %v501_v17 }
 0x435   :  { %5299 = vrsqrt.f32 %v503_v18 }
 0x43b   :  { %v5298_v19 = vpop.eup %5297 }
 0x43c   :  { %v506_v21 = vmul.f32 %v5298_v19, %v490_v57  ;;  %v4058_v57 = vld [vmem:[%s6281_s6 + $0xa8] sm:$0xff] }
 0x43d   :  { %v5030_v58 = vpack.c.bf16 %v4058_v57, %v4057_v56 }
 0x43e   :  { %v508_v23 = vmul.f32 %v506_v21, %v479_v20 }
 0x43f   :  { %v5300_v24 = vpop.eup %5299 }
 0x440   :  { %v5640_v25 = vadd.f32 %v508_v23, %v480_v22  ;;  %v507_v26 = vmul.f32 %v5300_v24, %v491_v61  ;;  %v5034_v61 = vpack.c.bf16 %v4060_v60, %v4059_v59 }
 0x442   :  { %v509_v27 = vmul.f32 %v507_v26, %v479_v20  ;;  %4527 = vmatprep.mubr.msk.f32.mxu1 %vm81_vm0, %v5640_v25  ;;  %4545 = vmatprep.mubr.msk.f32.mxu0 %vm81_vm0, %v5640_v25 }
 0x444   :  { %v5646_v28 = vadd.f32 %v509_v27, %v480_v22 }
 0x446   :  { %4528 = vmatmul.mubr.msk.f32.vlgmr.msra.gmra.mrb[4].mxu1 %vm81_vm0, %v5646_v28  ;;  %4546 = vmatmul.mubr.msk.f32.vlgmr.msra.gmra.mrb[2].mxu0 %vm81_vm0, %v5646_v28  ;;  %v5660_v30 = vpack.c.bf16 %v5646_v28, %v5640_v25 }
 0x448   :  { %4974 = vmatprep.subr.msk.bf16.mxu1 %vm5650_vm2, %v5660_v30  ;;  %4996 = vmatprep.subr.msk.bf16.mxu0 %vm5650_vm2, %v5660_v30 }
 0x449   :  { %4977 = vmatpush3.bf16.xpose.msk.msra.mxu1 %vm5650_vm2, %v5660_v30  ;;  %4999 = vmatpush3.bf16.xpose.msk.msra.mxu0 %vm5650_vm2, %v5660_v30 }
 0x44a   :  { %4987 = vmatprep.subr.bf16.mxu1 %v4986_v33 }
 0x519   :  { %v4529_v36 = vpop.f32.mrb[4].mxu1  ;;  %v4547_v37 = vpop.f32.mrb[2].mxu0 }
 0x51a   :  { %v593_v38 = vpop.f32.mrb[5].mxu1  ;;  %v773_v39 = vpop.f32.mrb[3].mxu0 }
 0x51b   :  { %v5686_v41 = vpack.c.bf16 %v4547_v37, %v773_v39  ;;  %4534 = vmatprep.mubr.msk.f32.mxu1 %vm81_vm0, %v593_v38 }
 0x51c   :  { %4535 = vmatmul.mubr.msk.f32.vlgmr.msra.gmra.mrb[6].mxu1 %vm81_vm0, %v4529_v36 }
 0x51d   :  { %4989 = vmatpush3.bf16.msra.mxu1 %v4986_v33  ;;  %4556 = vmatprep.mubr.msk.f32.mxu1 %vm81_vm0, %v5640_v25 }
 0x51e   :  { %4991 = vmatprep.subr.bf16.mxu1 %v4990_v40 }
 0x521   :  { %4993 = vmatpush3.bf16.msra.mxu1 %v4990_v40 }
 0x522   :  { %5001 = vmatprep.subr.bf16.mxu1 %v5000_v44 }
 0x524   :  { %4557 = vmatmul.mubr.msk.f32.vlgmr.msra.gmra.mrb[8].mxu1 %vm81_vm0, %v5646_v28 }
 0x525   :  { %5003 = vmatpush3.bf16.msra.mxu1 %v5000_v44  ;;  %4574 = vmatprep.mubr.msk.f32.mxu1 %vm81_vm0, %v5640_v25 }
 0x526   :  { %5005 = vmatprep.subr.bf16.mxu1 %v5004_v47 }
 0x529   :  { %5007 = vmatpush3.bf16.msra.mxu1 %v5004_v47 }
 0x52a   :  { %5017 = vmatprep.subr.bf16.mxu1 %v5016_v50 }
 0x52c   :  { %4575 = vmatmul.mubr.msk.f32.vlgmr.msra.gmra.mrb[10].mxu1 %vm81_vm0, %v5646_v28 }
 0x52d   :  { %5019 = vmatpush3.bf16.msra.mxu1 %v5016_v50  ;;  %4599 = vmatprep.mubr.msk.f32.mxu1 %vm81_vm0, %v5640_v25 }
 0x52e   :  { %5021 = vmatprep.subr.bf16.mxu1 %v5020_v55 }
 0x531   :  { %5023 = vmatpush3.bf16.msra.mxu1 %v5020_v55 }
 0x532   :  { %5031 = vmatprep.subr.bf16.mxu1 %v5030_v58 }
 0x534   :  { %4600 = vmatmul.mubr.msk.f32.vlgmr.msra.gmra.mrb[12].mxu1 %vm81_vm0, %v5646_v28 }
 0x535   :  { %5033 = vmatpush3.bf16.msra.mxu1 %v5030_v58  ;;  %4617 = vmatprep.mubr.msk.f32.mxu1 %vm81_vm0, %v5640_v25 }
 0x536   :  { %5035 = vmatprep.subr.bf16.mxu1 %v5034_v61 }
 0x539   :  { %5037 = vmatpush3.bf16.msra.mxu1 %v5034_v61 }
 0x53a   :  { %5052 = vmatprep.subr.msk.bf16.mxu1 %vm5650_vm2, %v5660_v30 }
 0x53c   :  { %4618 = vmatmul.mubr.msk.f32.vlgmr.msra.gmra.mrb[14].mxu1 %vm81_vm0, %v5646_v28 }
 0x542   :  { %5055 = vmatpush3.bf16.xpose.msk.msra.mxu1 %vm5650_vm2, %v5660_v30 }
 0x5ef   :  { %v4536_v62 = vpop.f32.mrb[6].mxu1 }
 0x5f0   :  { %v674_v63 = vpop.f32.mrb[7].mxu1  ;;  %v684_v17 = vsel %vm478_vm3, %v4536_v62, -1e+09 }
 0x5f1   :  { %v683_v19 = vsel %vm477_vm4, %v674_v63, -1e+09  ;;  %v688_v20 = vsel %vm389_vm1, %v684_v17, -inf }
 0x5f2   :  { %v685_v21 = vsel %vm389_vm1, %v683_v19, -inf }
 0x5f7   :  { %v4558_v0 = vpop.f32.mrb[8].mxu1 }
 0x5f8   :  { %v858_v1 = vpop.f32.mrb[9].mxu1 }
 0x5f9   :  { %4563 = vmatprep.mubr.msk.f32.mxu0 %vm81_vm0, %v858_v1 }
 0x5fa   :  { %4564 = vmatmul.mubr.msk.f32.vlgmr.msra.gmra.mrb[4].mxu0 %vm81_vm0, %v4558_v0 }
 0x5ff   :  { %v4576_v2 = vpop.f32.mrb[10].mxu1 }
 0x600   :  { %v1038_v3 = vpop.f32.mrb[11].mxu1 }
 0x601   :  { %v5008_v4 = vpack.c.bf16 %v4576_v2, %v1038_v3 }
 0x603   :  { %5009 = vmatprep.subr.bf16.mxu0 %v5008_v4 }
 0x604   :  { %5011 = vmatpush3.bf16.msra.mxu0 %v5008_v4 }
 0x605   :  { %5013 = vmatprep.subr.bf16.mxu0 %v5686_v41 }
 0x607   :  { %v5751_v5 = vpop.f32.mrb[12].mxu1 }
 0x608   :  { %v5753_v6 = vpop.f32.mrb[13].mxu1 }
 0x60f   :  { %v4619_v7 = vpop.f32.mrb[14].mxu1 }
 0x610   :  { %v1465_v8 = vpop.f32.mrb[15].mxu1 }
 0x611   :  { %v5755_v9 = vpack.c.bf16 %v4619_v7, %v1465_v8 }
 0x6cd   :  { %v4565_v12 = vpop.f32.mrb[4].mxu0 }
 0x6ce   :  { %v949_v13 = vsel %vm478_vm3, %v4565_v12, -1e+09  ;;  %v939_v14 = vpop.f32.mrb[5].mxu0 }
 0x6cf   :  { %v948_v15 = vsel %vm477_vm4, %v939_v14, -1e+09  ;;  %v953_v16 = vsel %vm389_vm1, %v949_v13, -inf  ;;  %v4072_v14 = vld [vmem:[%s6281_s6 + $0xc8] sm:$0xff] }
 0x6d0   :  { %954 = vmax.xlane.f32.xlu1 %v953_v16  ;;  %v950_v18 = vsel %vm389_vm1, %v948_v15, -inf }
 0x6d1   :  { %951 = vmax.xlane.f32.xlu0 %v950_v18 }
 0x6d4   :  { %689 = vmax.xlane.f32.xlu1 %v688_v20  ;;  %v4074_v20 = vld [vmem:[%s6281_s6 + $0xd8] sm:$0xff] }
 0x6d5   :  { %686 = vmax.xlane.f32.xlu0 %v685_v21 }
 0x75d   :  { %v955_v22 = vpop.xlane.xlu1 %954 }
 0x75e   :  { %v957_v23 = vsub.f32 %v949_v13, %v955_v22  ;;  %v952_v24 = vpop.xlane.xlu0 %951  ;;  %v4071_v13 = vld [vmem:[%s6281_s6 + $0xc0] sm:$0xff] }
 0x75f   :  { %v956_v26 = vsub.f32 %v948_v15, %v952_v24  ;;  %v5042_v15 = vpack.c.bf16 %v4072_v14, %v4071_v13 }
 0x760   :  { %v960_v27 = vmul.f32 1.442695, %v957_v23 }
 0x761   :  { %v958_v31 = vmul.f32 1.442695, %v956_v26  ;;  %v690_v32 = vpop.xlane.xlu1 %689  ;;  %v4075_v26 = vld [vmem:[%s6281_s6 + $0xe0] sm:$0xff] }
 0x762   :  { %5301 = vpow2.f32 %v960_v27  ;;  %v692_v33 = vsub.f32 %v684_v17, %v690_v32  ;;  %v687_v34 = vpop.xlane.xlu0 %686  ;;  %v4076_v27 = vld [vmem:[%s6281_s6 + $0xe8] sm:$0xff]  ;;  %v4077_v32 = vld [vmem:[%s6281_s6 + $0xf0] sm:$0xff] }
 0x763   :  { %5303 = vpow2.f32 %v958_v31  ;;  %v691_v35 = vsub.f32 %v683_v19, %v687_v34  ;;  %v4073_v19 = vld [vmem:[%s6281_s6 + $0xd0] sm:$0xff]  ;;  %v5056_v31 = vpack.c.bf16 %v4076_v27, %v4075_v26  ;;  %v1946_v26 = vld [vmem:[#allocation7 + $0x20] sm:$0xff] }
 0x764   :  { %v695_v36 = vmul.f32 1.442695, %v692_v33  ;;  %v5046_v24 = vpack.c.bf16 %v4074_v20, %v4073_v19  ;;  %v4078_v33 = vld [vmem:[%s6281_s6 + $0xf8] sm:$0xff]  ;;  %v1942_v19 = vld [vmem:[#allocation7] sm:$0xff]  ;;  %v1944_v20 = vld [vmem:[#allocation7 + $0x10] sm:$0xff] }
 0x765   :  { %v693_v37 = vmul.f32 1.442695, %v691_v35  ;;  %v5060_v34 = vpack.c.bf16 %v4078_v33, %v4077_v32  ;;  %v1948_v27 = vld [vmem:[#allocation7 + $0x30] sm:$0xff]  ;;  %v5494_v32 = vmov 0.0  }
 0x766   :  { %5305 = vpow2.f32 %v695_v36 }
 0x767   :  { %5307 = vpow2.f32 %v693_v37 }
 0x76c   :  { %v5302_v38 = vpop.eup %5301 }
 0x76d   :  { %v5304_v39 = vpop.eup %5303  ;;  %v965_v40 = vsel %vm389_vm1, %v5302_v38, 0.0 }
 0x76e   :  { %966 = vadd.xlane.f32.xlu1 %v965_v40  ;;  %v962_v42 = vsel %vm389_vm1, %v5304_v39, 0.0 }
 0x76f   :  { %963 = vadd.xlane.f32.xlu0 %v962_v42 }
 0x770   :  { %v5306_v43 = vpop.eup %5305 }
 0x771   :  { %v5308_v44 = vpop.eup %5307  ;;  %v700_v45 = vsel %vm389_vm1, %v5306_v43, 0.0 }
 0x772   :  { %701 = vadd.xlane.f32.xlu1 %v700_v45  ;;  %v697_v46 = vsel %vm389_vm1, %v5308_v44, 0.0 }
 0x773   :  { %698 = vadd.xlane.f32.xlu0 %v697_v46 }
 0x7fb   :  { %v967_v47 = vpop.xlane.xlu1 %966 }
 0x7fc   :  { %5309 = vrcp.f32 %v967_v47  ;;  %v964_v48 = vpop.xlane.xlu0 %963 }
 0x7fd   :  { %5311 = vrcp.f32 %v964_v48 }
 0x7ff   :  { %v702_v50 = vpop.xlane.xlu1 %701 }
 0x800   :  { %v699_v49 = vpop.xlane.xlu0 %698 }
 0x801   :  { %5313 = vrcp.f32 %v699_v49 }
 0x802   :  { %5315 = vrcp.f32 %v702_v50 }
 0x806   :  { %v5310_v53 = vpop.eup %5309 }
 0x807   :  { %v5312_v54 = vpop.eup %5311  ;;  %v971_v56 = vmul.f32 %v5310_v53, %v5302_v38 }
 0x808   :  { %v969_v55 = vmul.f32 %v5312_v54, %v5304_v39 }
 0x80a   :  { %4581 = vmatprep.mubr.msk.f32.mxu0 %vm389_vm1, %v969_v55 }
 0x80b   :  { %v5314_v57 = vpop.eup %5313  ;;  %4582 = vmatmul.mubr.msk.f32.vlgmr.msra.gmra.mrb[6].mxu0 %vm389_vm1, %v971_v56 }
 0x80c   :  { %5015 = vmatpush3.bf16.msra.mxu0 %v5686_v41  ;;  %v704_v58 = vmul.f32 %v5314_v57, %v5308_v44  ;;  %v5316_v59 = vpop.eup %5315 }
 0x80d   :  { %5026 = vmatprep.subr.msk.bf16.mxu0 %vm5650_vm2, %v5660_v30  ;;  %v706_v60 = vmul.f32 %v5316_v59, %v5306_v43 }
 0x80e   :  { %4588 = vmatprep.mubr.msk.f32.mxu0 %vm389_vm1, %v704_v58 }
 0x813   :  { %4589 = vmatmul.mubr.msk.f32.vlgmr.msra.gmra.mrb[6].mxu0 %vm389_vm1, %v706_v60 }
 0x814   :  { %4606 = vmatprep.mubr.msk.f32.mxu0 %vm81_vm0, %v5753_v6 }
 0x815   :  { %5029 = vmatpush3.bf16.xpose.msk.msra.mxu0 %vm5650_vm2, %v5660_v30 }
 0x816   :  { %5039 = vmatprep.subr.bf16.mxu0 %v5755_v9 }
 0x81c   :  { %4607 = vmatmul.mubr.msk.f32.vlgmr.msra.gmra.mrb[8].mxu0 %vm81_vm0, %v5751_v5 }
 0x81d   :  { %5041 = vmatpush3.bf16.msra.mxu0 %v5755_v9 }
 0x81e   :  { %5043 = vmatprep.subr.bf16.mxu0 %v5042_v15 }
 0x8ef   :  { %v4608_v41 = vpop.f32.mrb[8].mxu0 }
 0x8f0   :  { %v1376_v61 = vsel %vm478_vm3, %v4608_v41, -1e+09  ;;  %v1366_v62 = vpop.f32.mrb[9].mxu0 }
 0x8f1   :  { %v1375_v63 = vsel %vm477_vm4, %v1366_v62, -1e+09  ;;  %v1380_v0 = vsel %vm389_vm1, %v1376_v61, -inf }
 0x8f2   :  { %1381 = vmax.xlane.f32.xlu1 %v1380_v0  ;;  %v1377_v30 = vsel %vm389_vm1, %v1375_v63, -inf }
 0x8f3   :  { %1378 = vmax.xlane.f32.xlu0 %v1377_v30 }
 0x97f   :  { %v1382_v1 = vpop.xlane.xlu1 %1381 }
 0x980   :  { %v1384_v2 = vsub.f32 %v1376_v61, %v1382_v1  ;;  %v1379_v3 = vpop.xlane.xlu0 %1378 }
 0x981   :  { %v1383_v4 = vsub.f32 %v1375_v63, %v1379_v3  ;;  %v1907_v63 = vld [vmem:[#allocation2 + $0x13] ss:$0 sm:$0xff] }
 0x982   :  { %v1387_v5 = vmul.f32 1.442695, %v1384_v2 }
 0x983   :  { %v1385_v6 = vmul.f32 1.442695, %v1383_v4 }
 0x984   :  { %5317 = vpow2.f32 %v1387_v5 }
 0x985   :  { %5319 = vpow2.f32 %v1385_v6 }
 0x98e   :  { %v5318_v7 = vpop.eup %5317 }
 0x98f   :  { %v5320_v8 = vpop.eup %5319  ;;  %v1392_v9 = vsel %vm389_vm1, %v5318_v7, 0.0 }
 0x990   :  { %1393 = vadd.xlane.f32.xlu1 %v1392_v9  ;;  %v1389_v12 = vsel %vm389_vm1, %v5320_v8, 0.0 }
 0x991   :  { %1390 = vadd.xlane.f32.xlu0 %v1389_v12 }
 0xa1d   :  { %v1394_v16 = vpop.xlane.xlu1 %1393 }
 0xa1e   :  { %5321 = vrcp.f32 %v1394_v16  ;;  %v1391_v17 = vpop.xlane.xlu0 %1390  ;;  %v1943_v16 = vld [vmem:[#allocation7 + $0x8] sm:$0xff] }
 0xa1f   :  { %5323 = vrcp.f32 %v1391_v17  ;;  %v1945_v17 = vld [vmem:[#allocation7 + $0x18] sm:$0xff] }
 0xa28   :  { %v5322_v18 = vpop.eup %5321 }
 0xa29   :  { %v5324_v21 = vpop.eup %5323  ;;  %v1398_v23 = vmul.f32 %v5322_v18, %v5318_v7  ;;  %v5068_v18 = vpack.c.bf16 %v1945_v17, %v1943_v16 }
 0xa2a   :  { %v1396_v22 = vmul.f32 %v5324_v21, %v5320_v8  ;;  %v5070_v21 = vpack.c.bf16 %v1944_v20, %v1942_v19 }
 0xa2b   :  { %5069 = vmatprep.subr.bf16.mxu1 %v5068_v18 }
 0xa2c   :  { %4624 = vmatprep.mubr.msk.f32.mxu0 %vm389_vm1, %v1396_v22  ;;  %v1947_v22 = vld [vmem:[#allocation7 + $0x28] sm:$0xff] }
 0xa2d   :  { %4625 = vmatmul.mubr.msk.f32.vlgmr.msra.gmra.mrb[6].mxu0 %vm389_vm1, %v1398_v23  ;;  %v1949_v23 = vld [vmem:[#allocation7 + $0x38] sm:$0xff] }
 0xa2e   :  { %5045 = vmatpush3.bf16.msra.mxu0 %v5042_v15  ;;  %4635 = vmatprep.mubr.msk.f32.mxu0 %vm81_vm0, %v5640_v25 }
 0xa2f   :  { %5047 = vmatprep.subr.bf16.mxu0 %v5046_v24 }
 0xa32   :  { %5049 = vmatpush3.bf16.msra.mxu0 %v5046_v24  ;;  %v5072_v24 = vpack.c.bf16 %v1949_v23, %v1947_v22 }
 0xa33   :  { %5057 = vmatprep.subr.bf16.mxu0 %v5056_v31 }
 0xa35   :  { %4636 = vmatmul.mubr.msk.f32.vlgmr.msra.gmra.mrb[10].mxu0 %vm81_vm0, %v5646_v28 }
 0xa36   :  { %5059 = vmatpush3.bf16.msra.mxu0 %v5056_v31  ;;  %4653 = vmatprep.mubr.msk.f32.mxu0 %vm81_vm0, %v5640_v25  ;;  %v5074_v31 = vpack.c.bf16 %v1948_v27, %v1946_v26 }
 0xa37   :  { %5061 = vmatprep.subr.bf16.mxu0 %v5060_v34 }
 0xa3a   :  { %5063 = vmatpush3.bf16.msra.mxu0 %v5060_v34 }
 0xa3d   :  { %4654 = vmatmul.mubr.msk.f32.vlgmr.msra.gmra.mrb[12].mxu0 %vm81_vm0, %v5646_v28 }
 0xb08   :  { %v4637_v35 = vpop.f32.mrb[10].mxu0 }
 0xb09   :  { %v1633_v36 = vpop.f32.mrb[11].mxu0 }
 0xb0a   :  { %4642 = vmatprep.mubr.msk.f32.mxu1 %vm81_vm0, %v1633_v36 }
 0xb0b   :  { %4643 = vmatmul.mubr.msk.f32.vlgmr.msra.gmra.mrb[16].mxu1 %vm81_vm0, %v4637_v35 }
 0xb0c   :  { %5071 = vmatpush1.bf16.msra.mxu1 %v5070_v21  ;;  %2033 = vmatprep.mubr.f32.mxu1 %v5494_v32 }
 0xb0d   :  { %5073 = vmatprep.subr.bf16.mxu1 %v5072_v24 }
 0xb10   :  { %v4655_v37 = vpop.f32.mrb[12].mxu0  ;;  %5075 = vmatpush1.bf16.msra.mxu1 %v5074_v31 }
 0xb11   :  { %v1813_v38 = vpop.f32.mrb[13].mxu0 }
 0xb12   :  { %v5064_v39 = vpack.c.bf16 %v4655_v37, %v1813_v38 }
 0xb14   :  { %5065 = vmatprep.subr.bf16.mxu0 %v5064_v39 }
 0xb15   :  { %5067 = vmatpush3.bf16.msra.mxu0 %v5064_v39 }
 0xbde   :  { %v4644_v40 = vpop.f32.mrb[16].mxu1 }
 0xbdf   :  { %v1724_v25 = vsel %vm478_vm3, %v4644_v40, -1e+09  ;;  %v1714_v42 = vpop.f32.mrb[17].mxu1 }
 0xbe0   :  { %v1723_v43 = vsel %vm477_vm4, %v1714_v42, -1e+09  ;;  %v1728_v28 = vsel %vm389_vm1, %v1724_v25, -inf }
 0xbe1   :  { %1729 = vmax.xlane.f32.xlu1 %v1728_v28  ;;  %v1725_v44 = vsel %vm389_vm1, %v1723_v43, -inf  ;;  %v1911_v28 = vld [vmem:[#allocation2 + $0x15] ss:$0 sm:$0xff] }
 0xbe2   :  { %1726 = vmax.xlane.f32.xlu0 %v1725_v44 }
 0xc6e   :  { %v1730_v45 = vpop.xlane.xlu1 %1729 }
 0xc6f   :  { %v1732_v46 = vsub.f32 %v1724_v25, %v1730_v45  ;;  %v1727_v47 = vpop.xlane.xlu0 %1726  ;;  %v1910_v25 = vld [vmem:[#allocation2 + $0x14] ss:$0 sm:$0xff] }
 0xc70   :  { %v1731_v48 = vsub.f32 %v1723_v43, %v1727_v47 }
 0xc71   :  { %v1735_v49 = vmul.f32 1.442695, %v1732_v46 }
 0xc72   :  { %v1733_v50 = vmul.f32 1.442695, %v1731_v48  ;;  %v2066_v48 = vld [vmem:[%s6283_s8] sm:$0xff] }
 0xc73   :  { %5325 = vpow2.f32 %v1735_v49  ;;  %v2067_v49 = vld [vmem:[%s6283_s8 + $0x8] sm:$0xff] }
 0xc74   :  { %5327 = vpow2.f32 %v1733_v50  ;;  %v5076_v50 = vpack.c.bf16 %v2067_v49, %v2066_v48 }
 0xc76   :  { %5077 = vmatprep.subr.bf16.mxu1 %v5076_v50 }
 0xc7d   :  { %v5326_v53 = vpop.eup %5325 }
 0xc7e   :  { %v5328_v54 = vpop.eup %5327  ;;  %v1740_v55 = vsel %vm389_vm1, %v5326_v53, 0.0 }
 0xc7f   :  { %1741 = vadd.xlane.f32.xlu1 %v1740_v55  ;;  %v1737_v56 = vsel %vm389_vm1, %v5328_v54, 0.0 }
 0xc80   :  { %1738 = vadd.xlane.f32.xlu0 %v1737_v56  ;;  %v2070_v56 = vld [vmem:[%s6283_s8 + $0x20] sm:$0xff] }
 0xd0c   :  { %v1742_v57 = vpop.xlane.xlu1 %1741 }
 0xd0d   :  { %5329 = vrcp.f32 %v1742_v57  ;;  %v1739_v58 = vpop.xlane.xlu0 %1738  ;;  %v2071_v57 = vld [vmem:[%s6283_s8 + $0x28] sm:$0xff] }
 0xd0e   :  { %5331 = vrcp.f32 %v1739_v58  ;;  %v5084_v58 = vpack.c.bf16 %v2071_v57, %v2070_v56 }
 0xd17   :  { %v5330_v59 = vpop.eup %5329 }
 0xd18   :  { %v5332_v60 = vpop.eup %5331  ;;  %v1746_v61 = vmul.f32 %v5330_v59, %v5326_v53  ;;  %v2068_v53 = vld [vmem:[%s6283_s8 + $0x10] sm:$0xff] }
 0xd19   :  { %v1744_v41 = vmul.f32 %v5332_v60, %v5328_v54  ;;  %v2069_v54 = vld [vmem:[%s6283_s8 + $0x18] sm:$0xff]  ;;  %v2072_v59 = vld [vmem:[%s6283_s8 + $0x30] sm:$0xff] }
 0xd1a   :  { %v5080_v55 = vpack.c.bf16 %v2069_v54, %v2068_v53  ;;  %v2073_v60 = vld [vmem:[%s6283_s8 + $0x38] sm:$0xff] }
 0xd1b   :  { %4660 = vmatprep.mubr.msk.f32.mxu0 %vm389_vm1, %v1744_v41  ;;  %v5088_v41 = vpack.c.bf16 %v2073_v60, %v2072_v59 }
 0xd1c   :  { %4661 = vmatmul.mubr.msk.f32.vlgmr.msra.gmra.mrb[6].mxu0 %vm389_vm1, %v1746_v61  ;;  %v2074_v61 = vld [vmem:[%s6283_s8 + $0x40] sm:$0xff] }
 0xdef   :  { %v4662_v62 = vpop.f32.mrb[6].mxu0 }
 0xdf0   :  { %v1906_v0 = vadd.f32 %v5606_v52, %v4662_v62  ;;  %v1894_v30 = vpop.f32.mrb[7].mxu0  ;;  %v2075_v62 = vld [vmem:[%s6283_s8 + $0x48] sm:$0xff] }
 0xdf1   :  { %v1905_v1 = vadd.f32 %v5604_v51, %v1894_v30  ;;  %v2077_v30 = vld [vmem:[%s6283_s8 + $0x58] sm:$0xff] }
 0xdf2   :  { %v5858_v2 = vadd.f32 %v1907_v63, %v1906_v0  ;;  %v2076_v0 = vld [vmem:[%s6283_s8 + $0x50] sm:$0xff] }
 0xdf3   :  { %v5860_v3 = vadd.f32 %v1907_v63, %v1905_v1  ;;  %v5092_v63 = vpack.c.bf16 %v2075_v62, %v2074_v61  ;;  %v5096_v1 = vpack.c.bf16 %v2077_v30, %v2076_v0 }
 0xdf4   :  { %v1915_v4 = vsel %vm81_vm0, %v5858_v2, 0.0 }
 0xdf5   :  { %1916 = vadd.xlane.f32.xlu1 %v1915_v4  ;;  %v1912_v5 = vsel %vm81_vm0, %v5860_v3, 0.0  ;;  %v2078_v4 = vld [vmem:[%s6283_s8 + $0x60] sm:$0xff] }
 0xdf6   :  { %1913 = vadd.xlane.f32.xlu0 %v1912_v5  ;;  %v2079_v5 = vld [vmem:[%s6283_s8 + $0x68] sm:$0xff] }
 0xe82   :  { %v1917_v6 = vpop.xlane.xlu1 %1916 }
 0xe83   :  { %v1919_v7 = vmul.f32 0.03125, %v1917_v6  ;;  %v1914_v8 = vpop.xlane.xlu0 %1913  ;;  %v5100_v6 = vpack.c.bf16 %v2079_v5, %v2078_v4  ;;  %v4091_v4 = vld [vmem:[%s6281_s6 + $0x100] sm:$0xff]  ;;  %v4092_v5 = vld [vmem:[%s6281_s6 + $0x108] sm:$0xff] }
 0xe84   :  { %v1918_v9 = vmul.f32 0.03125, %v1914_v8  ;;  %v2081_v8 = vld [vmem:[%s6283_s8 + $0x78] sm:$0xff] }
 0xe85   :  { %v1921_v52 = vsub.f32 %v5858_v2, %v1919_v7  ;;  %v2080_v7 = vld [vmem:[%s6283_s8 + $0x70] sm:$0xff] }
 0xe86   :  { %v1920_v51 = vsub.f32 %v5860_v3, %v1918_v9  ;;  %v5104_v9 = vpack.c.bf16 %v2081_v8, %v2080_v7  ;;  %v4093_v7 = vld [vmem:[%s6281_s6 + $0x110] sm:$0xff]  ;;  %v4094_v8 = vld [vmem:[%s6281_s6 + $0x118] sm:$0xff] }
 0xe87   :  { %v1923_v12 = vmul.f32 %v1921_v52, %v1921_v52 }
 0xe88   :  { %v1922_v13 = vmul.f32 %v1920_v51, %v1920_v51 }
 0xe89   :  { %v1927_v14 = vsel %vm81_vm0, %v1923_v12, 0.0 }
 0xe8a   :  { %1928 = vadd.xlane.f32.xlu1 %v1927_v14  ;;  %v1924_v15 = vsel %vm81_vm0, %v1922_v13, 0.0  ;;  %v1951_v13 = vld [vmem:[#allocation2 + $0x17] ss:$8 sm:$0x3] }
 0xe8b   :  { %1925 = vadd.xlane.f32.xlu0 %v1924_v15 }
 0xf17   :  { %v1929_v33 = vpop.xlane.xlu1 %1928 }
 0xf18   :  { %v1931_v34 = vmul.f32 0.03125, %v1929_v33  ;;  %v1926_v35 = vpop.xlane.xlu0 %1925 }
 0xf19   :  { %v1930_v36 = vmul.f32 0.03125, %v1926_v35 }
 0xf1a   :  { %v1933_v37 = vadd.f32 1e-05, %v1931_v34 }
 0xf1b   :  { %v1932_v38 = vadd.f32 1e-05, %v1930_v36 }
 0xf1c   :  { %5333 = vrsqrt.f32 %v1933_v37 }
 0xf1d   :  { %5335 = vrsqrt.f32 %v1932_v38 }
 0xf26   :  { %v5334_v39 = vpop.eup %5333 }
 0xf27   :  { %v5336_v40 = vpop.eup %5335  ;;  %v1937_v43 = vmul.f32 %v5334_v39, %v1921_v52  ;;  %v1953_v52 = vlaneseq }
 0xf28   :  { %v1936_v42 = vmul.f32 %v5336_v40, %v1920_v51 }
 0xf29   :  { %v1939_v46 = vmul.f32 %v1937_v43, %v1910_v25  ;;  %v5922_v51 = vshrl.u32 %v1953_v52, 7 }
 0xf2a   :  { %v1938_v44 = vmul.f32 %v1936_v42, %v1910_v25 }
 0xf2b   :  { %v1941_v47 = vadd.f32 %v1939_v46, %v1911_v28  ;;  %v1959_v12 = vsub.s32 1, %v5922_v51  ;;  %v1955_v36 = vsub.s32 0, %v5922_v51 }
 0xf2c   :  { %v1940_v45 = vadd.f32 %v1938_v44, %v1911_v28 }
 0xf2d   :  { %v1960_v14 = vrot.slane %v1951_v13, %v1959_v12  ;;  %v1956_v38 = vrot.slane %v1951_v13, %v1955_v36 }
 0xf2e   :  { %4089 = vmatmul.mubr.msk.f32.vlgmr.msra.gmra.mrb[18].mxu1 %vm81_vm0, %v1940_v45 }
 0xf2f   :  { %2039 = vmatprep.mubr.f32.mxu1 %v5494_v32  ;;  %5079 = vmatpush3.bf16.msra.mxu1 %v5076_v50  ;;  %v2159_v50 = vld [vmem:[#allocation2 + $0x16] ss:$0 sm:$0xff] }
 0xf30   :  { %5081 = vmatprep.subr.bf16.mxu1 %v5080_v55 }
 0xf32   :  { %4090 = vmatmul.mubr.msk.f32.gmra.mrb[20].mxu1 %vm81_vm0, %v1941_v47 }
 0xf33   :  { %5083 = vmatpush3.bf16.msra.mxu1 %v5080_v55 }
 0xf34   :  { %5085 = vmatprep.subr.bf16.mxu1 %v5084_v58 }
 0xf37   :  { %5087 = vmatpush3.bf16.msra.mxu1 %v5084_v58 }
 0xf38   :  { %5089 = vmatprep.subr.bf16.mxu1 %v5088_v41 }
 0xf3b   :  { %5091 = vmatpush3.bf16.msra.mxu1 %v5088_v41 }
 0xf3c   :  { %5093 = vmatprep.subr.bf16.mxu1 %v5092_v63 }
 0xf3f   :  { %5095 = vmatpush3.bf16.msra.mxu1 %v5092_v63 }
 0xf40   :  { %5097 = vmatprep.subr.bf16.mxu1 %v5096_v1 }
 0xf43   :  { %5099 = vmatpush3.bf16.msra.mxu1 %v5096_v1 }
 0xf44   :  { %5101 = vmatprep.subr.bf16.mxu1 %v5100_v6 }
 0xf47   :  { %5103 = vmatpush3.bf16.msra.mxu1 %v5100_v6  ;;  %v5108_v6 = vpack.c.bf16 %v4092_v5, %v4091_v4  ;;  %v4145_v4 = vld [vmem:[%s6281_s6 + $0x1c0] sm:$0xff]  ;;  %v4146_v5 = vld [vmem:[%s6281_s6 + $0x1c8] sm:$0xff] }
 0xf48   :  { %5105 = vmatprep.subr.bf16.mxu1 %v5104_v9 }
 0xf49   :  { %5109 = vmatprep.subr.bf16.mxu0 %v5108_v6 }
 0xf4a   :  { %5111 = vmatpush3.bf16.msra.mxu0 %v5108_v6  ;;  %v5186_v6 = vpack.c.bf16 %v4146_v5, %v4145_v4 }
 0xf4b   :  { %5107 = vmatpush3.bf16.msra.mxu1 %v5104_v9  ;;  %v5112_v9 = vpack.c.bf16 %v4094_v8, %v4093_v7  ;;  %v4147_v7 = vld [vmem:[%s6281_s6 + $0x1d0] sm:$0xff]  ;;  %v4148_v8 = vld [vmem:[%s6281_s6 + $0x1d8] sm:$0xff] }
 0xf4d   :  { %5113 = vmatprep.subr.bf16.mxu0 %v5112_v9 }
 0xf4e   :  { %5115 = vmatpush3.bf16.msra.mxu0 %v5112_v9  ;;  %v5190_v9 = vpack.c.bf16 %v4148_v8, %v4147_v7 }
0x1001   :  { %v2035_v15 = vpop.f32.mrb[18].mxu1 }
0x1002   :  { %v2037_v16 = vpop.f32.mrb[19].mxu1  ;;  %v2036_v42 = vadd.f32 %v2035_v15, %v1956_v38 }
0x1003   :  { %v2038_v17 = vadd.f32 %v2037_v16, %v1960_v14 }
0x1005   :  { %v2046_v18 = vmul.f32 %v2038_v17, %v2038_v17  ;;  %v2041_v19 = vpop.f32.mrb[20].mxu1 }
0x1006   :  { %v2043_v20 = vpop.f32.mrb[21].mxu1  ;;  %v2042_v46 = vadd.f32 %v2041_v19, %v1956_v38  ;;  %v2162_v19 = vld [vmem:[#allocation2 + $0x20] ss:$0 sm:$0xff]  ;;  %v4097_v38 = vld [vmem:[%s6281_s6 + $0x130] sm:$0xff] }
0x1007   :  { %v2048_v21 = vmul.f32 %v2046_v18, %v2038_v17  ;;  %v2044_v22 = vadd.f32 %v2043_v20, %v1960_v14 }
0x1009   :  { %v2050_v23 = vmul.f32 0.044715, %v2048_v21  ;;  %v2047_v24 = vmul.f32 %v2044_v22, %v2044_v22 }
0x100b   :  { %v2052_v26 = vadd.f32 %v2050_v23, %v2038_v17  ;;  %v2049_v27 = vmul.f32 %v2047_v24, %v2044_v22 }
0x100d   :  { %v2054_v31 = vmul.f32 0.7978846, %v2052_v26  ;;  %v2051_v33 = vmul.f32 0.044715, %v2049_v27 }
0x100f   :  { %5337 = vtanh.f32 %v2054_v31  ;;  %v2053_v34 = vadd.f32 %v2051_v33, %v2044_v22 }
0x1011   :  { %v2055_v35 = vmul.f32 0.7978846, %v2053_v34  ;;  %v4095_v34 = vld [vmem:[%s6281_s6 + $0x120] sm:$0xff] }
0x1013   :  { %5339 = vtanh.f32 %v2055_v35  ;;  %v4096_v35 = vld [vmem:[%s6281_s6 + $0x128] sm:$0xff] }
0x1019   :  { %v5338_v37 = vpop.eup %5337 }
0x101a   :  { %v2058_v39 = vadd.f32 1.0, %v5338_v37  ;;  %v5122_v37 = vpack.c.bf16 %v4096_v35, %v4095_v34 }
0x101c   :  { %v2060_v40 = vmul.f32 0.5, %v2058_v39  ;;  %v4098_v39 = vld [vmem:[%s6281_s6 + $0x138] sm:$0xff] }
0x101d   :  { %v5340_v25 = vpop.eup %5339 }
0x101e   :  { %v2059_v43 = vadd.f32 1.0, %v5340_v25  ;;  %v2062_v28 = vmul.f32 %v2060_v40, %v2038_v17 }
0x1020   :  { %v2061_v44 = vmul.f32 0.5, %v2059_v43  ;;  %v2064_v45 = vmul.f32 %v2062_v28, %v2036_v42  ;;  %v5126_v42 = vpack.c.bf16 %v4098_v39, %v4097_v38  ;;  %v4107_v43 = vld [vmem:[%s6281_s6 + $0x140] sm:$0xff]  ;;  %v4108_v28 = vld [vmem:[%s6281_s6 + $0x148] sm:$0xff] }
0x1022   :  { %v2063_v47 = vmul.f32 %v2061_v44, %v2044_v22  ;;  %4695 = vmatprep.mubr.f32.mxu1 %v2064_v45  ;;  %v2163_v22 = vld [vmem:[#allocation2 + $0x21] ss:$0 sm:$0xff]  ;;  %v5130_v44 = vpack.c.bf16 %v4108_v28, %v4107_v43  ;;  %v4109_v45 = vld [vmem:[%s6281_s6 + $0x150] sm:$0xff] }
0x1024   :  { %v2065_v48 = vmul.f32 %v2063_v47, %v2042_v46  ;;  %v4110_v46 = vld [vmem:[%s6281_s6 + $0x158] sm:$0xff] }
0x1025   :  { %v5134_v47 = vpack.c.bf16 %v4110_v46, %v4109_v45 }
0x1026   :  { %4696 = vmatmul.mubr.f32.vlgmr.msra.gmra.mrb[22].mxu1 %v2065_v48  ;;  %v4111_v48 = vld [vmem:[%s6281_s6 + $0x160] sm:$0xff] }
0x10f9   :  { %v4697_v49 = vpop.f32.mrb[22].mxu1 }
0x10fa   :  { %v2158_v53 = vadd.f32 %v4697_v49, %v5858_v2  ;;  %v2148_v54 = vpop.f32.mrb[23].mxu1  ;;  %v4112_v49 = vld [vmem:[%s6281_s6 + $0x168] sm:$0xff] }
0x10fb   :  { %v2157_v55 = vadd.f32 %v2148_v54, %v5860_v3  ;;  %v4114_v54 = vld [vmem:[%s6281_s6 + $0x178] sm:$0xff] }
0x10fc   :  { %v5932_v56 = vadd.f32 %v2159_v50, %v2158_v53  ;;  %v4113_v53 = vld [vmem:[%s6281_s6 + $0x170] sm:$0xff] }
0x10fd   :  { %v5934_v57 = vadd.f32 %v2159_v50, %v2157_v55  ;;  %v5144_v50 = vpack.c.bf16 %v4112_v49, %v4111_v48  ;;  %v5148_v55 = vpack.c.bf16 %v4114_v54, %v4113_v53 }
0x10fe   :  { %v2167_v58 = vsel %vm81_vm0, %v5932_v56, 0.0 }
0x10ff   :  { %2168 = vadd.xlane.f32.xlu1 %v2167_v58  ;;  %v2164_v59 = vsel %vm81_vm0, %v5934_v57, 0.0  ;;  %v4127_v58 = vld [vmem:[%s6281_s6 + $0x180] sm:$0xff] }
0x1100   :  { %2165 = vadd.xlane.f32.xlu0 %v2164_v59  ;;  %v4128_v59 = vld [vmem:[%s6281_s6 + $0x188] sm:$0xff] }
0x118c   :  { %v2169_v60 = vpop.xlane.xlu1 %2168 }
0x118d   :  { %v2171_v41 = vmul.f32 0.03125, %v2169_v60  ;;  %v2166_v61 = vpop.xlane.xlu0 %2165  ;;  %v5160_v60 = vpack.c.bf16 %v4128_v59, %v4127_v58 }
0x118e   :  { %v2170_v62 = vmul.f32 0.03125, %v2166_v61  ;;  %v4130_v61 = vld [vmem:[%s6281_s6 + $0x198] sm:$0xff] }
0x118f   :  { %v2173_v2 = vsub.f32 %v5932_v56, %v2171_v41  ;;  %v4129_v41 = vld [vmem:[%s6281_s6 + $0x190] sm:$0xff] }
0x1190   :  { %v2172_v3 = vsub.f32 %v5934_v57, %v2170_v62  ;;  %v5164_v62 = vpack.c.bf16 %v4130_v61, %v4129_v41 }
0x1191   :  { %v2175_v63 = vmul.f32 %v2173_v2, %v2173_v2 }
0x1192   :  { %v2174_v0 = vmul.f32 %v2172_v3, %v2172_v3 }
0x1193   :  { %v2179_v30 = vsel %vm81_vm0, %v2175_v63, 0.0 }
0x1194   :  { %2180 = vadd.xlane.f32.xlu1 %v2179_v30  ;;  %v2176_v1 = vsel %vm81_vm0, %v2174_v0, 0.0  ;;  %v4133_v0 = vld [vmem:[%s6281_s6 + $0x1b0] sm:$0xff]  ;;  %v4134_v30 = vld [vmem:[%s6281_s6 + $0x1b8] sm:$0xff] }
0x1195   :  { %2177 = vadd.xlane.f32.xlu0 %v2176_v1  ;;  %v5178_v1 = vpack.c.bf16 %v4134_v30, %v4133_v0 }
0x1221   :  { %v2181_v52 = vpop.xlane.xlu1 %2180 }
0x1222   :  { %v2183_v13 = vmul.f32 0.03125, %v2181_v52  ;;  %v2178_v14 = vpop.xlane.xlu0 %2177  ;;  %v4149_v52 = vld [vmem:[%s6281_s6 + $0x1e0] sm:$0xff] }
0x1223   :  { %v2182_v15 = vmul.f32 0.03125, %v2178_v14 }
0x1224   :  { %v2185_v16 = vadd.f32 1e-05, %v2183_v13  ;;  %v4150_v13 = vld [vmem:[%s6281_s6 + $0x1e8] sm:$0xff] }
0x1225   :  { %v2184_v17 = vadd.f32 1e-05, %v2182_v15  ;;  %v5200_v14 = vpack.c.bf16 %v4150_v13, %v4149_v52  ;;  %v4151_v15 = vld [vmem:[%s6281_s6 + $0x1f0] sm:$0xff] }
0x1226   :  { %5341 = vrsqrt.f32 %v2185_v16  ;;  %v4152_v16 = vld [vmem:[%s6281_s6 + $0x1f8] sm:$0xff] }
0x1227   :  { %5343 = vrsqrt.f32 %v2184_v17  ;;  %v5204_v17 = vpack.c.bf16 %v4152_v16, %v4151_v15 }
0x1230   :  { %v5342_v18 = vpop.eup %5341 }
0x1231   :  { %v5344_v20 = vpop.eup %5343  ;;  %v2189_v21 = vmul.f32 %v5342_v18, %v2173_v2  ;;  %v4131_v2 = vld [vmem:[%s6281_s6 + $0x1a0] sm:$0xff] }
0x1232   :  { %v2188_v23 = vmul.f32 %v5344_v20, %v2172_v3  ;;  %v4132_v3 = vld [vmem:[%s6281_s6 + $0x1a8] sm:$0xff] }
0x1233   :  { %v2191_v24 = vmul.f32 %v2189_v21, %v2162_v19  ;;  %v5174_v63 = vpack.c.bf16 %v4132_v3, %v4131_v2 }
0x1234   :  { %v2190_v26 = vmul.f32 %v2188_v23, %v2162_v19 }
0x1235   :  { %v5956_v27 = vadd.f32 %v2191_v24, %v2163_v22 }
0x1236   :  { %v5958_v31 = vadd.f32 %v2190_v26, %v2163_v22 }
0x1238   :  { %4706 = vmatprep.mubr.msk.f32.mxu0 %vm81_vm0, %v5958_v31  ;;  %v5964_v33 = vpack.c.bf16 %v5956_v27, %v5958_v31 }
0x1239   :  { %4707 = vmatmul.mubr.msk.f32.vlgmr.msra.gmra.mrb[14].mxu0 %vm81_vm0, %v5956_v27 }
0x123a   :  { %5118 = vmatprep.subr.msk.bf16.mxu0 %vm5650_vm2, %v5964_v33  ;;  %5140 = vmatprep.subr.msk.bf16.mxu1 %vm5650_vm2, %v5964_v33 }
0x123b   :  { %5121 = vmatpush3.bf16.xpose.msk.msra.mxu0 %vm5650_vm2, %v5964_v33  ;;  %5143 = vmatpush3.bf16.xpose.msk.msra.mxu1 %vm5650_vm2, %v5964_v33 }
0x123c   :  { %5123 = vmatprep.subr.bf16.mxu0 %v5122_v37 }
0x130c   :  { %v4708_v40 = vpop.f32.mrb[14].mxu0 }
0x130d   :  { %v2276_v25 = vpop.f32.mrb[15].mxu0 }
0x130e   :  { %4713 = vmatprep.mubr.msk.f32.mxu0 %vm81_vm0, %v2276_v25 }
0x130f   :  { %4714 = vmatmul.mubr.msk.f32.vlgmr.msra.gmra.mrb[16].mxu0 %vm81_vm0, %v4708_v40 }
0x1310   :  { %5125 = vmatpush3.bf16.msra.mxu0 %v5122_v37  ;;  %4724 = vmatprep.mubr.msk.f32.mxu0 %vm81_vm0, %v5958_v31 }
0x1311   :  { %5127 = vmatprep.subr.bf16.mxu0 %v5126_v42 }
0x1314   :  { %5129 = vmatpush3.bf16.msra.mxu0 %v5126_v42 }
0x1315   :  { %5131 = vmatprep.subr.bf16.mxu0 %v5130_v44 }
0x1317   :  { %4725 = vmatmul.mubr.msk.f32.vlgmr.msra.gmra.mrb[18].mxu0 %vm81_vm0, %v5956_v27 }
0x1318   :  { %5133 = vmatpush3.bf16.msra.mxu0 %v5130_v44  ;;  %4735 = vmatprep.mubr.msk.f32.mxu0 %vm81_vm0, %v5958_v31 }
0x1319   :  { %5135 = vmatprep.subr.bf16.mxu0 %v5134_v47 }
0x131c   :  { %5137 = vmatpush3.bf16.msra.mxu0 %v5134_v47 }
0x131d   :  { %5145 = vmatprep.subr.bf16.mxu0 %v5144_v50 }
0x131f   :  { %4736 = vmatmul.mubr.msk.f32.vlgmr.msra.gmra.mrb[20].mxu0 %vm81_vm0, %v5956_v27 }
0x1320   :  { %5147 = vmatpush3.bf16.msra.mxu0 %v5144_v50  ;;  %4753 = vmatprep.mubr.msk.f32.mxu0 %vm81_vm0, %v5958_v31 }
0x1321   :  { %5149 = vmatprep.subr.bf16.mxu0 %v5148_v55 }
0x1324   :  { %5151 = vmatpush3.bf16.msra.mxu0 %v5148_v55 }
0x1325   :  { %5161 = vmatprep.subr.bf16.mxu0 %v5160_v60 }
0x1327   :  { %4754 = vmatmul.mubr.msk.f32.vlgmr.msra.gmra.mrb[22].mxu0 %vm81_vm0, %v5956_v27 }
0x1328   :  { %5163 = vmatpush3.bf16.msra.mxu0 %v5160_v60  ;;  %4778 = vmatprep.mubr.msk.f32.mxu0 %vm81_vm0, %v5958_v31 }
0x1329   :  { %5165 = vmatprep.subr.bf16.mxu0 %v5164_v62 }
0x132c   :  { %5167 = vmatpush3.bf16.msra.mxu0 %v5164_v62 }
0x132d   :  { %5175 = vmatprep.subr.bf16.mxu0 %v5174_v63 }
0x132f   :  { %4779 = vmatmul.mubr.msk.f32.vlgmr.msra.gmra.mrb[24].mxu0 %vm81_vm0, %v5956_v27 }
0x1330   :  { %5177 = vmatpush3.bf16.msra.mxu0 %v5174_v63  ;;  %4796 = vmatprep.mubr.msk.f32.mxu0 %vm81_vm0, %v5958_v31 }
0x1331   :  { %5179 = vmatprep.subr.bf16.mxu0 %v5178_v1 }
0x1334   :  { %5181 = vmatpush3.bf16.msra.mxu0 %v5178_v1 }
0x1335   :  { %5187 = vmatprep.subr.bf16.mxu0 %v5186_v6 }
0x1337   :  { %4797 = vmatmul.mubr.msk.f32.vlgmr.msra.gmra.mrb[26].mxu0 %vm81_vm0, %v5956_v27 }
0x1338   :  { %5189 = vmatpush3.bf16.msra.mxu0 %v5186_v6  ;;  %4814 = vmatprep.mubr.msk.f32.mxu0 %vm81_vm0, %v5958_v31 }
0x1339   :  { %5191 = vmatprep.subr.bf16.mxu0 %v5190_v9 }
0x133c   :  { %5193 = vmatpush3.bf16.msra.mxu0 %v5190_v9 }
0x133d   :  { %5201 = vmatprep.subr.bf16.mxu0 %v5200_v14 }
0x133f   :  { %4815 = vmatmul.mubr.msk.f32.vlgmr.msra.gmra.mrb[28].mxu0 %vm81_vm0, %v5956_v27 }
0x1340   :  { %5203 = vmatpush3.bf16.msra.mxu0 %v5200_v14  ;;  %4832 = vmatprep.mubr.msk.f32.mxu0 %vm81_vm0, %v5958_v31 }
0x1341   :  { %5205 = vmatprep.subr.bf16.mxu0 %v5204_v17 }
0x1344   :  { %5207 = vmatpush3.bf16.msra.mxu0 %v5204_v17 }
0x1347   :  { %4833 = vmatmul.mubr.msk.f32.vlgmr.msra.gmra.mrb[30].mxu0 %vm81_vm0, %v5956_v27 }
0x13e2   :  { %v4715_v18 = vpop.f32.mrb[16].mxu0 }
0x13e3   :  { %v2357_v19 = vpop.f32.mrb[17].mxu0  ;;  %v2367_v49 = vsel %vm478_vm3, %v4715_v18, -1e+09 }
0x13e4   :  { %v2366_v53 = vsel %vm477_vm4, %v2357_v19, -1e+09  ;;  %v2371_v54 = vsel %vm389_vm1, %v2367_v49, -inf }
0x13e5   :  { %v2368_v55 = vsel %vm389_vm1, %v2366_v53, -inf }
0x13ea   :  { %v4726_v20 = vpop.f32.mrb[18].mxu0 }
0x13eb   :  { %v2456_v21 = vpop.f32.mrb[19].mxu0 }
0x13ec   :  { %v6094_v22 = vpack.c.bf16 %v4726_v20, %v2456_v21 }
0x13f2   :  { %v4737_v23 = vpop.f32.mrb[20].mxu0 }
0x13f3   :  { %v2541_v24 = vpop.f32.mrb[21].mxu0 }
0x13f4   :  { %4742 = vmatprep.mubr.msk.f32.mxu1 %vm81_vm0, %v2541_v24 }
0x13f5   :  { %4743 = vmatmul.mubr.msk.f32.vlgmr.msra.gmra.mrb[24].mxu1 %vm81_vm0, %v4737_v23 }
0x13fa   :  { %v4755_v26 = vpop.f32.mrb[22].mxu0 }
0x13fb   :  { %v2721_v34 = vpop.f32.mrb[23].mxu0 }
0x13fc   :  { %v5152_v31 = vpack.c.bf16 %v4755_v26, %v2721_v34 }
0x13fe   :  { %5153 = vmatprep.subr.bf16.mxu1 %v5152_v31 }
0x13ff   :  { %5155 = vmatpush3.bf16.msra.mxu1 %v5152_v31 }
0x1400   :  { %5157 = vmatprep.subr.bf16.mxu1 %v6094_v22 }
0x1402   :  { %v6099_v27 = vpop.f32.mrb[24].mxu0 }
0x1403   :  { %v6101_v35 = vpop.f32.mrb[25].mxu0 }
0x140a   :  { %v4798_v37 = vpop.f32.mrb[26].mxu0 }
0x140b   :  { %v3148_v38 = vpop.f32.mrb[27].mxu0 }
0x140c   :  { %v6103_v39 = vpack.c.bf16 %v4798_v37, %v3148_v38 }
0x1412   :  { %v6105_v40 = vpop.f32.mrb[28].mxu0 }
0x1413   :  { %v6107_v25 = vpop.f32.mrb[29].mxu0 }
0x141a   :  { %v4834_v42 = vpop.f32.mrb[30].mxu0 }
0x141b   :  { %v3496_v43 = vpop.f32.mrb[31].mxu0 }
0x141c   :  { %v6109_v28 = vpack.c.bf16 %v4834_v42, %v3496_v43 }
0x14c8   :  { %v4744_v44 = vpop.f32.mrb[24].mxu1 }
0x14c9   :  { %v2632_v45 = vsel %vm478_vm3, %v4744_v44, -1e+09  ;;  %v2622_v46 = vpop.f32.mrb[25].mxu1 }
0x14ca   :  { %v2631_v47 = vsel %vm477_vm4, %v2622_v46, -1e+09  ;;  %v2636_v48 = vsel %vm389_vm1, %v2632_v45, -inf }
0x14cb   :  { %2637 = vmax.xlane.f32.xlu1 %v2636_v48  ;;  %v2633_v50 = vsel %vm389_vm1, %v2631_v47, -inf }
0x14cc   :  { %2634 = vmax.xlane.f32.xlu0 %v2633_v50 }
0x14cf   :  { %2372 = vmax.xlane.f32.xlu1 %v2371_v54 }
0x14d0   :  { %2369 = vmax.xlane.f32.xlu0 %v2368_v55 }
0x1558   :  { %v2638_v58 = vpop.xlane.xlu1 %2637 }
0x1559   :  { %v2640_v59 = vsub.f32 %v2632_v45, %v2638_v58  ;;  %v2635_v60 = vpop.xlane.xlu0 %2634 }
0x155a   :  { %v2639_v41 = vsub.f32 %v2631_v47, %v2635_v60 }
0x155b   :  { %v2643_v61 = vmul.f32 1.442695, %v2640_v59 }
0x155c   :  { %v2641_v62 = vmul.f32 1.442695, %v2639_v41  ;;  %v2373_v2 = vpop.xlane.xlu1 %2372 }
0x155d   :  { %5345 = vpow2.f32 %v2643_v61  ;;  %v2375_v3 = vsub.f32 %v2367_v49, %v2373_v2  ;;  %v2370_v63 = vpop.xlane.xlu0 %2369 }
0x155e   :  { %5347 = vpow2.f32 %v2641_v62  ;;  %v2374_v0 = vsub.f32 %v2366_v53, %v2370_v63 }
0x155f   :  { %v2378_v30 = vmul.f32 1.442695, %v2375_v3 }
0x1560   :  { %v2376_v1 = vmul.f32 1.442695, %v2374_v0 }
0x1561   :  { %5349 = vpow2.f32 %v2378_v30 }
0x1562   :  { %5351 = vpow2.f32 %v2376_v1 }
0x1567   :  { %v5346_v4 = vpop.eup %5345 }
0x1568   :  { %v5348_v5 = vpop.eup %5347  ;;  %v2648_v6 = vsel %vm389_vm1, %v5346_v4, 0.0 }
0x1569   :  { %2649 = vadd.xlane.f32.xlu1 %v2648_v6  ;;  %v2645_v7 = vsel %vm389_vm1, %v5348_v5, 0.0 }
0x156a   :  { %2646 = vadd.xlane.f32.xlu0 %v2645_v7 }
0x156b   :  { %v5350_v8 = vpop.eup %5349 }
0x156c   :  { %v5352_v9 = vpop.eup %5351  ;;  %v2383_v52 = vsel %vm389_vm1, %v5350_v8, 0.0 }
0x156d   :  { %2384 = vadd.xlane.f32.xlu1 %v2383_v52  ;;  %v2380_v13 = vsel %vm389_vm1, %v5352_v9, 0.0 }
0x156e   :  { %2381 = vadd.xlane.f32.xlu0 %v2380_v13  ;;  %v3590_v13 = vld [vmem:[#allocation2 + $0x22] ss:$0 sm:$0xff] }
0x15f6   :  { %v2650_v14 = vpop.xlane.xlu1 %2649 }
0x15f7   :  { %5353 = vrcp.f32 %v2650_v14  ;;  %v2647_v15 = vpop.xlane.xlu0 %2646 }
0x15f8   :  { %5355 = vrcp.f32 %v2647_v15 }
0x15fa   :  { %v2385_v17 = vpop.xlane.xlu1 %2384 }
0x15fb   :  { %v2382_v16 = vpop.xlane.xlu0 %2381 }
0x15fc   :  { %5357 = vrcp.f32 %v2382_v16 }
0x15fd   :  { %5359 = vrcp.f32 %v2385_v17 }
0x1601   :  { %v5354_v18 = vpop.eup %5353 }
0x1602   :  { %v5356_v19 = vpop.eup %5355  ;;  %v2654_v21 = vmul.f32 %v5354_v18, %v5346_v4 }
0x1603   :  { %v2652_v20 = vmul.f32 %v5356_v19, %v5348_v5 }
0x1605   :  { %4760 = vmatprep.mubr.msk.f32.mxu1 %vm389_vm1, %v2652_v20 }
0x1606   :  { %v5358_v23 = vpop.eup %5357  ;;  %4761 = vmatmul.mubr.msk.f32.vlgmr.msra.gmra.mrb[26].mxu1 %vm389_vm1, %v2654_v21 }
0x1607   :  { %5159 = vmatpush3.bf16.msra.mxu1 %v6094_v22  ;;  %v2387_v24 = vmul.f32 %v5358_v23, %v5352_v9  ;;  %v5360_v26 = vpop.eup %5359 }
0x1608   :  { %5170 = vmatprep.subr.msk.bf16.mxu1 %vm5650_vm2, %v5964_v33  ;;  %v2389_v34 = vmul.f32 %v5360_v26, %v5350_v8 }
0x1609   :  { %4767 = vmatprep.mubr.msk.f32.mxu1 %vm389_vm1, %v2387_v24 }
0x160e   :  { %4768 = vmatmul.mubr.msk.f32.vlgmr.msra.gmra.mrb[26].mxu1 %vm389_vm1, %v2389_v34 }
0x160f   :  { %4785 = vmatprep.mubr.msk.f32.mxu1 %vm81_vm0, %v6101_v35 }
0x1610   :  { %5173 = vmatpush3.bf16.xpose.msk.msra.mxu1 %vm5650_vm2, %v5964_v33 }
0x1611   :  { %5183 = vmatprep.subr.bf16.mxu1 %v6103_v39 }
0x1617   :  { %4786 = vmatmul.mubr.msk.f32.vlgmr.msra.gmra.mrb[28].mxu1 %vm81_vm0, %v6099_v27 }
0x1618   :  { %5185 = vmatpush3.bf16.msra.mxu1 %v6103_v39 }
0x1619   :  { %5196 = vmatprep.subr.msk.bf16.mxu1 %vm5650_vm2, %v5964_v33 }
0x16ea   :  { %v4787_v22 = vpop.f32.mrb[28].mxu1 }
0x16eb   :  { %v3059_v31 = vsel %vm478_vm3, %v4787_v22, -1e+09  ;;  %v3049_v35 = vpop.f32.mrb[29].mxu1 }
0x16ec   :  { %v3058_v37 = vsel %vm477_vm4, %v3049_v35, -1e+09  ;;  %v3063_v38 = vsel %vm389_vm1, %v3059_v31, -inf }
0x16ed   :  { %3064 = vmax.xlane.f32.xlu1 %v3063_v38  ;;  %v3060_v42 = vsel %vm389_vm1, %v3058_v37, -inf  ;;  %v3629_v38 = vld [vmem:[#allocation7 + $0x58] sm:$0xff] }
0x16ee   :  { %3061 = vmax.xlane.f32.xlu0 %v3060_v42 }
0x177a   :  { %v3065_v27 = vpop.xlane.xlu1 %3064 }
0x177b   :  { %v3067_v39 = vsub.f32 %v3059_v31, %v3065_v27  ;;  %v3062_v43 = vpop.xlane.xlu0 %3061  ;;  %v3626_v27 = vld [vmem:[#allocation7 + $0x40] sm:$0xff] }
0x177c   :  { %v3066_v44 = vsub.f32 %v3058_v37, %v3062_v43  ;;  %v3627_v37 = vld [vmem:[#allocation7 + $0x48] sm:$0xff] }
0x177d   :  { %v3070_v45 = vmul.f32 1.442695, %v3067_v39  ;;  %v5212_v42 = vpack.c.bf16 %v3629_v38, %v3627_v37  ;;  %v3628_v39 = vld [vmem:[#allocation7 + $0x50] sm:$0xff] }
0x177e   :  { %v3068_v46 = vmul.f32 1.442695, %v3066_v44  ;;  %v5214_v43 = vpack.c.bf16 %v3628_v39, %v3626_v27  ;;  %v3631_v44 = vld [vmem:[#allocation7 + $0x68] sm:$0xff] }
0x177f   :  { %5361 = vpow2.f32 %v3070_v45  ;;  %v3633_v45 = vld [vmem:[#allocation7 + $0x78] sm:$0xff] }
0x1780   :  { %5363 = vpow2.f32 %v3068_v46  ;;  %v5216_v46 = vpack.c.bf16 %v3633_v45, %v3631_v44 }
0x1789   :  { %v5362_v47 = vpop.eup %5361 }
0x178a   :  { %v5364_v48 = vpop.eup %5363  ;;  %v3075_v49 = vsel %vm389_vm1, %v5362_v47, 0.0 }
0x178b   :  { %3076 = vadd.xlane.f32.xlu1 %v3075_v49  ;;  %v3072_v50 = vsel %vm389_vm1, %v5364_v48, 0.0 }
0x178c   :  { %3073 = vadd.xlane.f32.xlu0 %v3072_v50 }
0x1818   :  { %v3077_v53 = vpop.xlane.xlu1 %3076 }
0x1819   :  { %5365 = vrcp.f32 %v3077_v53  ;;  %v3074_v54 = vpop.xlane.xlu0 %3073 }
0x181a   :  { %5367 = vrcp.f32 %v3074_v54 }
0x1823   :  { %v5366_v55 = vpop.eup %5365 }
0x1824   :  { %v5368_v58 = vpop.eup %5367  ;;  %v3081_v60 = vmul.f32 %v5366_v55, %v5362_v47  ;;  %v3630_v47 = vld [vmem:[#allocation7 + $0x60] sm:$0xff] }
0x1825   :  { %v3079_v59 = vmul.f32 %v5368_v58, %v5364_v48  ;;  %v3632_v48 = vld [vmem:[#allocation7 + $0x70] sm:$0xff] }
0x1826   :  { %v5218_v49 = vpack.c.bf16 %v3632_v48, %v3630_v47 }
0x1827   :  { %4803 = vmatprep.mubr.msk.f32.mxu1 %vm389_vm1, %v3079_v59 }
0x1828   :  { %4804 = vmatmul.mubr.msk.f32.vlgmr.msra.gmra.mrb[26].mxu1 %vm389_vm1, %v3081_v60 }
0x1829   :  { %5199 = vmatpush3.bf16.xpose.msk.msra.mxu1 %vm5650_vm2, %v5964_v33  ;;  %4821 = vmatprep.mubr.msk.f32.mxu1 %vm81_vm0, %v6107_v25 }
0x182a   :  { %5209 = vmatprep.subr.bf16.mxu1 %v6109_v28 }
0x1830   :  { %4822 = vmatmul.mubr.msk.f32.vlgmr.msra.gmra.mrb[30].mxu1 %vm81_vm0, %v6105_v40 }
0x1831   :  { %5211 = vmatpush3.bf16.msra.mxu1 %v6109_v28 }
0x1832   :  { %5213 = vmatprep.subr.bf16.mxu1 %v5212_v42 }
0x1903   :  { %v4823_v41 = vpop.f32.mrb[30].mxu1 }
0x1904   :  { %v3407_v61 = vsel %vm478_vm3, %v4823_v41, -1e+09  ;;  %v3397_v62 = vpop.f32.mrb[31].mxu1 }
0x1905   :  { %v3406_v2 = vsel %vm477_vm4, %v3397_v62, -1e+09  ;;  %v3411_v29 = vsel %vm389_vm1, %v3407_v61, -inf }
0x1906   :  { %3412 = vmax.xlane.f32.xlu1 %v3411_v29  ;;  %v3408_v33 = vsel %vm389_vm1, %v3406_v2, -inf  ;;  %v3594_v29 = vld [vmem:[#allocation2 + $0x24] ss:$0 sm:$0xff] }
0x1907   :  { %3409 = vmax.xlane.f32.xlu0 %v3408_v33 }
0x1993   :  { %v3413_v25 = vpop.xlane.xlu1 %3412 }
0x1994   :  { %v3415_v3 = vsub.f32 %v3407_v61, %v3413_v25  ;;  %v3410_v63 = vpop.xlane.xlu0 %3409  ;;  %v3593_v61 = vld [vmem:[#allocation2 + $0x23] ss:$0 sm:$0xff] }
0x1995   :  { %v3414_v40 = vsub.f32 %v3406_v2, %v3410_v63 }
0x1996   :  { %v3418_v0 = vmul.f32 1.442695, %v3415_v3 }
0x1997   :  { %v3416_v28 = vmul.f32 1.442695, %v3414_v40  ;;  %v4165_v40 = vld [vmem:[%s6283_s8 + $0x80] sm:$0xff] }
0x1998   :  { %5369 = vpow2.f32 %v3418_v0  ;;  %v4166_v0 = vld [vmem:[%s6283_s8 + $0x88] sm:$0xff] }
0x1999   :  { %5371 = vpow2.f32 %v3416_v28  ;;  %v5220_v28 = vpack.c.bf16 %v4166_v0, %v4165_v40 }
0x199b   :  { %5221 = vmatprep.subr.bf16.mxu0 %v5220_v28 }
0x199c   :  { %5223 = vmatpush3.bf16.msra.mxu0 %v5220_v28 }
0x19a2   :  { %v5370_v10 = vpop.eup %5369 }
0x19a3   :  { %v5372_v30 = vpop.eup %5371  ;;  %v3423_v1 = vsel %vm389_vm1, %v5370_v10, 0.0 }
0x19a4   :  { %3424 = vadd.xlane.f32.xlu1 %v3423_v1  ;;  %v3420_v11 = vsel %vm389_vm1, %v5372_v30, 0.0  ;;  %v4169_v1 = vld [vmem:[%s6283_s8 + $0xa0] sm:$0xff] }
0x19a5   :  { %3421 = vadd.xlane.f32.xlu0 %v3420_v11  ;;  %v4170_v11 = vld [vmem:[%s6283_s8 + $0xa8] sm:$0xff] }
0x1a31   :  { %v3425_v4 = vpop.xlane.xlu1 %3424 }
0x1a32   :  { %5373 = vrcp.f32 %v3425_v4  ;;  %v3422_v5 = vpop.xlane.xlu0 %3421  ;;  %v5228_v4 = vpack.c.bf16 %v4170_v11, %v4169_v1 }
0x1a33   :  { %5375 = vrcp.f32 %v3422_v5  ;;  %v4171_v5 = vld [vmem:[%s6283_s8 + $0xb0] sm:$0xff] }
0x1a3c   :  { %v5374_v6 = vpop.eup %5373 }
0x1a3d   :  { %v5376_v7 = vpop.eup %5375  ;;  %v3429_v9 = vmul.f32 %v5374_v6, %v5370_v10  ;;  %v4167_v10 = vld [vmem:[%s6283_s8 + $0x90] sm:$0xff]  ;;  %v4172_v6 = vld [vmem:[%s6283_s8 + $0xb8] sm:$0xff] }
0x1a3e   :  { %v3427_v8 = vmul.f32 %v5376_v7, %v5372_v30  ;;  %v5232_v7 = vpack.c.bf16 %v4172_v6, %v4171_v5 }
0x1a40   :  { %4839 = vmatprep.mubr.msk.f32.mxu1 %vm389_vm1, %v3427_v8  ;;  %v4173_v8 = vld [vmem:[%s6283_s8 + $0xc0] sm:$0xff] }
0x1a41   :  { %4840 = vmatmul.mubr.msk.f32.vlgmr.msra.gmra.mrb[26].mxu1 %vm389_vm1, %v3429_v9  ;;  %v4174_v9 = vld [vmem:[%s6283_s8 + $0xc8] sm:$0xff] }
0x1a42   :  { %3717 = vmatprep.mubr.f32.mxu1 %v5494_v32  ;;  %5215 = vmatpush1.bf16.msra.mxu1 %v5214_v43 }
0x1a43   :  { %5217 = vmatprep.subr.bf16.mxu1 %v5216_v46 }
0x1a46   :  { %5219 = vmatpush1.bf16.msra.mxu1 %v5218_v49 }
0x1b14   :  { %v4841_v52 = vpop.f32.mrb[26].mxu1 }
0x1b15   :  { %v3589_v14 = vadd.f32 %v4841_v52, %v5932_v56  ;;  %v3577_v15 = vpop.f32.mrb[27].mxu1  ;;  %v5236_v52 = vpack.c.bf16 %v4174_v9, %v4173_v8 }
0x1b16   :  { %v3588_v16 = vadd.f32 %v3577_v15, %v5934_v57 }
0x1b17   :  { %v6179_v17 = vadd.f32 %v3590_v13, %v3589_v14  ;;  %v4176_v14 = vld [vmem:[%s6283_s8 + $0xd8] sm:$0xff] }
0x1b18   :  { %v6181_v18 = vadd.f32 %v3590_v13, %v3588_v16  ;;  %v4175_v13 = vld [vmem:[%s6283_s8 + $0xd0] sm:$0xff]  ;;  %v4177_v16 = vld [vmem:[%s6283_s8 + $0xe0] sm:$0xff] }
0x1b19   :  { %v3598_v19 = vsel %vm81_vm0, %v6179_v17, 0.0  ;;  %v5240_v15 = vpack.c.bf16 %v4176_v14, %v4175_v13 }
0x1b1a   :  { %3599 = vadd.xlane.f32.xlu1 %v3598_v19  ;;  %v3595_v20 = vsel %vm81_vm0, %v6181_v18, 0.0  ;;  %v4178_v19 = vld [vmem:[%s6283_s8 + $0xe8] sm:$0xff] }
0x1b1b   :  { %3596 = vadd.xlane.f32.xlu0 %v3595_v20  ;;  %v5244_v20 = vpack.c.bf16 %v4178_v19, %v4177_v16 }
0x1ba7   :  { %v3600_v21 = vpop.xlane.xlu1 %3599 }
0x1ba8   :  { %v3602_v23 = vmul.f32 0.03125, %v3600_v21  ;;  %v3597_v24 = vpop.xlane.xlu0 %3596  ;;  %v4179_v21 = vld [vmem:[%s6283_s8 + $0xf0] sm:$0xff] }
0x1ba9   :  { %v3601_v26 = vmul.f32 0.03125, %v3597_v24 }
0x1baa   :  { %v3604_v56 = vsub.f32 %v6179_v17, %v3602_v23  ;;  %v4180_v23 = vld [vmem:[%s6283_s8 + $0xf8] sm:$0xff] }
0x1bab   :  { %v3603_v57 = vsub.f32 %v6181_v18, %v3601_v26  ;;  %v5248_v24 = vpack.c.bf16 %v4180_v23, %v4179_v21  ;;  %v3635_v26 = vld [vmem:[#allocation2 + $0x26] ss:$8 sm:$0x3] }
0x1bac   :  { %v3606_v34 = vmul.f32 %v3604_v56, %v3604_v56 }
0x1bad   :  { %v3605_v22 = vmul.f32 %v3603_v57, %v3603_v57 }
0x1bae   :  { %v3610_v31 = vsel %vm81_vm0, %v3606_v34, 0.0 }
0x1baf   :  { %3611 = vadd.xlane.f32.xlu1 %v3610_v31  ;;  %v3607_v35 = vsel %vm81_vm0, %v3605_v22, 0.0 }
0x1bb0   :  { %3608 = vadd.xlane.f32.xlu0 %v3607_v35 }
0x1c3c   :  { %v3612_v50 = vpop.xlane.xlu1 %3611 }
0x1c3d   :  { %v3614_v53 = vmul.f32 0.03125, %v3612_v50  ;;  %v3609_v54 = vpop.xlane.xlu0 %3608 }
0x1c3e   :  { %v3613_v55 = vmul.f32 0.03125, %v3609_v54 }
0x1c3f   :  { %v3616_v58 = vadd.f32 1e-05, %v3614_v53 }
0x1c40   :  { %v3615_v59 = vadd.f32 1e-05, %v3613_v55 }
0x1c41   :  { %5377 = vrsqrt.f32 %v3616_v58 }
0x1c42   :  { %5379 = vrsqrt.f32 %v3615_v59 }
0x1c4b   :  { %v5378_v60 = vpop.eup %5377 }
0x1c4c   :  { %v5380_v41 = vpop.eup %5379  ;;  %v3620_v2 = vmul.f32 %v5378_v60, %v3604_v56  ;;  %v3644_v56 = vrot.slane %v3635_v26, %v1959_v12  ;;  %v3640_v12 = vrot.slane %v3635_v26, %v1955_v36 }
0x1c4d   :  { %v3619_v62 = vmul.f32 %v5380_v41, %v3603_v57 }
0x1c4e   :  { %v3622_v3 = vmul.f32 %v3620_v2, %v3593_v61 }
0x1c4f   :  { %v3621_v33 = vmul.f32 %v3619_v62, %v3593_v61 }
0x1c50   :  { %v3624_v63 = vadd.f32 %v3622_v3, %v3594_v29 }
0x1c51   :  { %v3623_v25 = vadd.f32 %v3621_v33, %v3594_v29  ;;  %v3844_v33 = vld [vmem:[#allocation2 + $0x25] ss:$0 sm:$0xff] }
0x1c53   :  { %4163 = vmatmul.mubr.msk.f32.vlgmr.msra.gmra.mrb[32].mxu1 %vm81_vm0, %v3623_v25 }
0x1c54   :  { %3723 = vmatprep.mubr.f32.mxu1 %v5494_v32  ;;  %v4168_v32 = vld [vmem:[%s6283_s8 + $0x98] sm:$0xff]  ;;  %s5495_s8 = smov [#allocation8]  }
0x1c55   :  { %v5224_v30 = vpack.c.bf16 %v4168_v32, %v4167_v10  ;;  %s4004_s4 = sshll.u32 %s5495_s8, 4  ;;  %s4005_s4 = int_to_ptr.vmem [resolvable:$true] %s4004_s4 }
0x1c56   :  { %s5459_s24 = scalar_lea.vmem %s4005_s4, 256  ;;  %p5464_p11 = scmp.lt.s32.totalorder %s4005_s4, %s4005_s4 }
0x1c57   :  { %4164 = vmatmul.mubr.msk.f32.gmra.mrb[34].mxu1 %vm81_vm0, %v3624_v63  ;;  %5225 = vmatprep.subr.bf16.mxu0 %v5224_v30  ;;  %p5460_p10 = scmp.ne.s32.totalorder %s4005_s4, %s5459_s24  ;;  %p5465_p12 = scmp.lt.s32.totalorder %s5459_s24, %s5459_s24 }
0x1c58   :  { %5227 = vmatpush3.bf16.msra.mxu0 %v5224_v30 }
0x1c59   :  { %5229 = vmatprep.subr.bf16.mxu0 %v5228_v4  ;;  %p5466_p13 = por %p5465_p12, %p5464_p11 }
0x1c5b   :  { %p5467_p0 = pnand %p5466_p13, %p5460_p10 }
0x1c5c   :  { %5231 = vmatpush3.bf16.msra.mxu0 %v5228_v4 }
0x1c5d   :  { %5233 = vmatprep.subr.bf16.mxu0 %v5232_v7 }
0x1c60   :  { %5235 = vmatpush3.bf16.msra.mxu0 %v5232_v7 }
0x1c61   :  { %5237 = vmatprep.subr.bf16.mxu0 %v5236_v52 }
0x1c64   :  { %5239 = vmatpush3.bf16.msra.mxu0 %v5236_v52 }
0x1c65   :  { %5241 = vmatprep.subr.bf16.mxu0 %v5240_v15 }
0x1c68   :  { %5243 = vmatpush3.bf16.msra.mxu0 %v5240_v15  ;;  %v3847_v15 = vld [vmem:[#allocation2 + $0x4] ss:$0 sm:$0xff] }
0x1c69   :  { %5245 = vmatprep.subr.bf16.mxu0 %v5244_v20 }
0x1c6c   :  { %5247 = vmatpush3.bf16.msra.mxu0 %v5244_v20  ;;  %v3848_v20 = vld [vmem:[#allocation2 + $0x5] ss:$0 sm:$0xff] }
0x1c6d   :  { %5249 = vmatprep.subr.bf16.mxu0 %v5248_v24 }
0x1c70   :  { %5251 = vmatpush3.bf16.msra.mxu0 %v5248_v24 }
0x1d26   :  { %v3719_v57 = vpop.f32.mrb[32].mxu1 }
0x1d27   :  { %v3721_v34 = vpop.f32.mrb[33].mxu1  ;;  %v3720_v55 = vadd.f32 %v3719_v57, %v3640_v12 }
0x1d28   :  { %v3722_v22 = vadd.f32 %v3721_v34, %v3644_v56 }
0x1d2a   :  { %v3730_v31 = vmul.f32 %v3722_v22, %v3722_v22  ;;  %v3725_v35 = vpop.f32.mrb[34].mxu1 }
0x1d2b   :  { %v3727_v37 = vpop.f32.mrb[35].mxu1  ;;  %v3726_v61 = vadd.f32 %v3725_v35, %v3640_v12 }
0x1d2c   :  { %v3732_v38 = vmul.f32 %v3730_v31, %v3722_v22  ;;  %v3728_v42 = vadd.f32 %v3727_v37, %v3644_v56 }
0x1d2e   :  { %v3734_v27 = vmul.f32 0.044715, %v3732_v38  ;;  %v3731_v39 = vmul.f32 %v3728_v42, %v3728_v42 }
0x1d30   :  { %v3736_v43 = vadd.f32 %v3734_v27, %v3722_v22  ;;  %v3733_v44 = vmul.f32 %v3731_v39, %v3728_v42 }
0x1d32   :  { %v3738_v45 = vmul.f32 0.7978846, %v3736_v43  ;;  %v3735_v46 = vmul.f32 0.044715, %v3733_v44 }
0x1d34   :  { %5381 = vtanh.f32 %v3738_v45  ;;  %v3737_v47 = vadd.f32 %v3735_v46, %v3728_v42  ;;  %v3911_v45 = vld [vmem:[#allocation5 + $0x130] sm:$0xff]  ;;  %v3912_v46 = vld [vmem:[#allocation5 + $0x138] sm:$0xff] }
0x1d36   :  { %v3739_v48 = vmul.f32 0.7978846, %v3737_v47  ;;  %v5252_v47 = vpack.c.bf16 %v3912_v46, %v3911_v45 }
0x1d38   :  { %5383 = vtanh.f32 %v3739_v48  ;;  %5253 = vmatprep.subr.bf16.mxu1 %v5252_v47  ;;  %v3913_v48 = vld [vmem:[#allocation5 + $0x140] sm:$0xff] }
0x1d39   :  { %5255 = vmatpush3.bf16.msra.mxu1 %v5252_v47 }
0x1d3e   :  { %v5382_v49 = vpop.eup %5381 }
0x1d3f   :  { %v3742_v50 = vadd.f32 1.0, %v5382_v49  ;;  %v3914_v49 = vld [vmem:[#allocation5 + $0x148] sm:$0xff] }
0x1d40   :  { %v5256_v12 = vpack.c.bf16 %v3914_v49, %v3913_v48 }
0x1d41   :  { %v3744_v53 = vmul.f32 0.5, %v3742_v50 }
0x1d42   :  { %v5384_v54 = vpop.eup %5383  ;;  %5257 = vmatprep.subr.bf16.mxu1 %v5256_v12 }
0x1d43   :  { %v3743_v58 = vadd.f32 1.0, %v5384_v54  ;;  %v3746_v59 = vmul.f32 %v3744_v53, %v3722_v22  ;;  %5259 = vmatpush3.bf16.msra.mxu1 %v5256_v12 }
0x1d45   :  { %v3745_v60 = vmul.f32 0.5, %v3743_v58  ;;  %v3748_v41 = vmul.f32 %v3746_v59, %v3720_v55 }
0x1d47   :  { %v3747_v62 = vmul.f32 %v3745_v60, %v3728_v42  ;;  %4874 = vmatprep.mubr.f32.mxu0 %v3748_v41  ;;  %v3879_v41 = vld [vmem:[#allocation2 + $0x6] ss:$0 sm:$0xff] }
0x1d49   :  { %v3749_v2 = vmul.f32 %v3747_v62, %v3726_v61 }
0x1d4b   :  { %4875 = vmatmul.mubr.f32.vlgmr.msra.gmra.mrb[32].mxu0 %v3749_v2 }
0x1e1e   :  { %v4876_v29 = vpop.f32.mrb[32].mxu0 }
0x1e1f   :  { %v3843_v25 = vadd.f32 %v4876_v29, %v6179_v17  ;;  %v3833_v3 = vpop.f32.mrb[33].mxu0  ;;  %v3880_v29 = vld [vmem:[#allocation2 + $0x7] ss:$0 sm:$0xff] }
0x1e20   :  { %v3842_v51 = vadd.f32 %v3833_v3, %v6181_v18 }
0x1e21   :  { %v3846_v36 = vadd.f32 %v3844_v33, %v3843_v25 }
0x1e22   :  { %v3845_v63 = vadd.f32 %v3844_v33, %v3842_v51 }
0x1e23   :  { %v3852_v40 = vsel %vm81_vm0, %v3846_v36, 0.0 }
0x1e24   :  { %3853 = vadd.xlane.f32.xlu1 %v3852_v40  ;;  %v3849_v0 = vsel %vm81_vm0, %v3845_v63, 0.0 }
0x1e25   :  { %3850 = vadd.xlane.f32.xlu0 %v3849_v0 }
0x1eb1   :  { %v3854_v28 = vpop.xlane.xlu1 %3853 }
0x1eb2   :  { %v3856_v10 = vmul.f32 0.03125, %v3854_v28  ;;  %v3851_v32 = vpop.xlane.xlu0 %3850 }
0x1eb3   :  { %v3855_v30 = vmul.f32 0.03125, %v3851_v32 }
0x1eb4   :  { %v3858_v1 = vsub.f32 %v3846_v36, %v3856_v10  ;;  %v3915_v36 = vld [vmem:[#allocation2 + $0x10] ss:$0 sm:$0xff] }
0x1eb5   :  { %v3857_v11 = vsub.f32 %v3845_v63, %v3855_v30 }
0x1eb6   :  { %v3860_v4 = vmul.f32 %v3858_v1, %v3858_v1 }
0x1eb7   :  { %v3859_v5 = vmul.f32 %v3857_v11, %v3857_v11 }
0x1eb8   :  { %v3864_v17 = vsel %vm81_vm0, %v3860_v4, 0.0 }
0x1eb9   :  { %3865 = vadd.xlane.f32.xlu1 %v3864_v17  ;;  %v3861_v18 = vsel %vm81_vm0, %v3859_v5, 0.0 }
0x1eba   :  { %3862 = vadd.xlane.f32.xlu0 %v3861_v18 }
0x1f46   :  { %v3866_v6 = vpop.xlane.xlu1 %3865 }
0x1f47   :  { %v3868_v7 = vmul.f32 0.03125, %v3866_v6  ;;  %v3863_v8 = vpop.xlane.xlu0 %3862 }
0x1f48   :  { %v3867_v9 = vmul.f32 0.03125, %v3863_v8 }
0x1f49   :  { %v3870_v52 = vadd.f32 1e-05, %v3868_v7 }
0x1f4a   :  { %v3869_v13 = vadd.f32 1e-05, %v3867_v9 }
0x1f4b   :  { %5385 = vrsqrt.f32 %v3870_v52 }
0x1f4c   :  { %5387 = vrsqrt.f32 %v3869_v13 }
0x1f55   :  { %v5386_v14 = vpop.eup %5385 }
0x1f56   :  { %v5388_v16 = vpop.eup %5387  ;;  %v3874_v19 = vmul.f32 %v5386_v14, %v3858_v1 }
0x1f57   :  { %v3873_v21 = vmul.f32 %v5388_v16, %v3857_v11 }
0x1f58   :  { %v3876_v23 = vmul.f32 %v3874_v19, %v3847_v15 }
0x1f59   :  { %v3875_v24 = vmul.f32 %v3873_v21, %v3847_v15 }
0x1f5a   :  { %v3878_v26 = vadd.f32 %v3876_v23, %v3848_v20 }
0x1f5b   :  { %v3877_v56 = vadd.f32 %v3875_v24, %v3848_v20 }
0x1f5c   :  { %v3884_v57 = vsel %vm81_vm0, %v3878_v26, 0.0 }
0x1f5d   :  { %3885 = vadd.xlane.f32.xlu1 %v3884_v57  ;;  %v3881_v34 = vsel %vm81_vm0, %v3877_v56, 0.0 }
0x1f5e   :  { %3882 = vadd.xlane.f32.xlu0 %v3881_v34 }
0x1fea   :  { %v3886_v22 = vpop.xlane.xlu1 %3885 }
0x1feb   :  { %v3888_v31 = vmul.f32 0.03125, %v3886_v22  ;;  %v3883_v35 = vpop.xlane.xlu0 %3882 }
0x1fec   :  { %v3887_v37 = vmul.f32 0.03125, %v3883_v35 }
0x1fed   :  { %v3890_v38 = vsub.f32 %v3878_v26, %v3888_v31 }
0x1fee   :  { %v3889_v42 = vsub.f32 %v3877_v56, %v3887_v37 }
0x1fef   :  { %v3892_v27 = vmul.f32 %v3890_v38, %v3890_v38 }
0x1ff0   :  { %v3891_v39 = vmul.f32 %v3889_v42, %v3889_v42 }
0x1ff1   :  { %v3896_v43 = vsel %vm81_vm0, %v3892_v27, 0.0 }
0x1ff2   :  { %3897 = vadd.xlane.f32.xlu1 %v3896_v43  ;;  %v3893_v44 = vsel %vm81_vm0, %v3891_v39, 0.0 }
0x1ff3   :  { %3894 = vadd.xlane.f32.xlu0 %v3893_v44 }
0x207f   :  { %v3898_v50 = vpop.xlane.xlu1 %3897 }
0x2080   :  { %v3900_v53 = vmul.f32 0.03125, %v3898_v50  ;;  %v3895_v54 = vpop.xlane.xlu0 %3894 }
0x2081   :  { %v3899_v55 = vmul.f32 0.03125, %v3895_v54 }
0x2082   :  { %v3902_v58 = vadd.f32 1e-05, %v3900_v53 }
0x2083   :  { %v3901_v59 = vadd.f32 1e-05, %v3899_v55 }
0x2084   :  { %5389 = vrsqrt.f32 %v3902_v58 }
0x2085   :  { %5391 = vrsqrt.f32 %v3901_v59 }
0x208e   :  { %v5390_v60 = vpop.eup %5389 }
0x208f   :  { %v5392_v61 = vpop.eup %5391  ;;  %v3906_v62 = vmul.f32 %v5390_v60, %v3890_v38 }
0x2090   :  { %v3905_v2 = vmul.f32 %v5392_v61, %v3889_v42 }
0x2091   :  { %v3908_v33 = vmul.f32 %v3906_v62, %v3879_v41 }
0x2092   :  { %v3907_v25 = vmul.f32 %v3905_v2, %v3879_v41 }
0x2093   :  { %v3910_v51 = vadd.f32 %v3908_v33, %v3880_v29 }
0x2094   :  { %v3909_v3 = vadd.f32 %v3907_v25, %v3880_v29 }
0x2096   :  { %4885 = vmatprep.mubr.msk.f32.mxu1 %vm81_vm0, %v3909_v3 }
0x2097   :  { %4886 = vmatmul.mubr.msk.f32.vlgmr.msra.gmra.mrb[36].mxu1 %vm81_vm0, %v3910_v51 }
0x216a   :  { %v4887_v63 = vpop.f32.mrb[36].mxu1 }
0x216b   :  { %v3994_v40 = vadd.f32 %v4887_v63, %v3915_v36  ;;  %v3988_v0 = vpop.f32.mrb[37].mxu1 }
0x216c   :  { %v3989_v28 = vadd.f32 %v3988_v0, %v3915_v36 }
0x216d   :  { %3998 = vst.msk [vmem:[#allocation8 + $0x8] sm:$0xff] %vm389_vm1, %v3994_v40 }
0x216e   :  { %3997 = vst.msk [vmem:[#allocation8] sm:$0xff] %vm389_vm1, %v3989_v28 }
0x216f   :  { %5470 = shalt.err (!%p5467_p0)
}
0x2170   :  { %s5471_s7 = scalar_lea.hbm %s6284_s9, 256 }
0x2171   :  { %p5472_p1 = scmp.ne.s32.totalorder %s6284_s9, %s5471_s7  ;;  %p5475_p2 = scmp.lt.u32.totalorder %s5471_s7, %s6284_s9 }
0x2173   :  { %p5477_p3 = pnand %p5475_p2, %p5472_p1 }
0x2175   :  { %5480 = shalt.err (!%p5477_p3)
}
0x2176   :  { %4010 = dma.vmem_to_hbm [thread:$0]  %s4005_s4, 256, %s6284_s9, [#allocation4], %s5488_s19, %s5488_s19, %s5489_s20  }
0x2177   :  { %5485 = dma.done.wait [#allocation4], 256  }
0x2178   :  { %5486 = vsyncadd [#allocation4], 4294967040 }
0x2179   :  { %4014 = vsyncpa [#allocation3], 1 }
0x217a   :  { %4015 = vsyncpa [#allocation6], 1 }
0x217b   :  { %4016 = vsyncpa [#allocation4], 1 }

</bundles_post_ra>
